<compile_context>
chip_gen: v7x
topology: tpu7x:2x2x1
jax: 0.10.0
libtpu: 0.0.40
codegen_flags: <defaults>
</compile_context>

<pallas_src>
import jax
import jax.numpy as jnp
from jax.experimental import pallas as pl
from jax.experimental.pallas import tpu as pltpu

LN_EPS = 1e-5
_DIVISORS_128 = (1, 2, 4, 8, 16, 32, 64, 128)


def _edge_processor_kernel(xi_ref, xj_ref, ea_ref,
                           w1ab_ref, w1c_ref, b1_ref,
                           w2_ref, b2_ref, pavg_ref, g_ref, beta_ref,
                           o_ref):
    """All edge tensors arrive 'packed': `pack` edges per lane-dense 128-wide row.

    Per-edge linears are matmuls against block-diagonal (kron) weights and the
    per-edge LayerNorm reduction is a block-diagonal averaging matmul, so no
    cross-lane relayout is ever needed inside the kernel.  Matmul operands are
    bf16 with f32 accumulation; SiLU / LN / residual arithmetic stays f32.
    """
    ea = ea_ref[...].astype(jnp.float32)                # residual needs full precision

    # ---- MLP layer 1: cat([x_i, x_j, e]) @ W1 folded into 2 block-diag matmuls.
    # x_i and x_j are lane-concatenated -> single K = 2*pack*D MXU operand.
    x = jnp.concatenate([xi_ref[...].astype(jnp.bfloat16),
                         xj_ref[...].astype(jnp.bfloat16)], axis=-1)
    h = (jnp.dot(x, w1ab_ref[...], preferred_element_type=jnp.float32)
         + jnp.dot(ea.astype(jnp.bfloat16), w1c_ref[...],
                   preferred_element_type=jnp.float32)
         + b1_ref[...])
    h = h * jax.nn.sigmoid(h)                           # SiLU, f32 (v5e has no bf16 VPU/EUP)

    # ---- MLP layer 2 (no activation after the last linear) ----
    y = (jnp.dot(h.astype(jnp.bfloat16), w2_ref[...],
                 preferred_element_type=jnp.float32) + b2_ref[...])

    # ---- Per-edge LayerNorm over each De-lane segment: mean/var as single-pass
    # bf16 MXU dots against a block-diagonal averaging matrix.
    mu = jnp.dot(y.astype(jnp.bfloat16), pavg_ref[...],
                 preferred_element_type=jnp.float32)
    c = y - mu
    var = jnp.dot((c * c).astype(jnp.bfloat16), pavg_ref[...],
                  preferred_element_type=jnp.float32)
    yn = c * (g_ref[...] * jax.lax.rsqrt(var + LN_EPS)) + beta_ref[...]

    # ---- residual; lane-dense (packed) store ----
    o_ref[...] = (ea + yn).astype(o_ref.dtype)


def edge_processor(x_i, x_j, edge_attr, params, *, tile_e=4096):
    """params: dict with w1 [2D+De, H], b1 [H], w2 [H, De], b2 [De], gamma [De], beta [De]."""
    E, D = x_i.shape
    De = edge_attr.shape[-1]
    out_dtype = edge_attr.dtype
    w1, b1, w2, b2, gamma, beta = (params["w1"], params["b1"], params["w2"],
                                   params["b2"], params["gamma"], params["beta"])
    H = w1.shape[-1]
    assert w1.shape[0] == 2 * D + De

    # ---- lane packing: `pack` edges per 128-lane row.  If De doesn't divide 128,
    # pad the edge-feature dim up to the nearest divisor of 128 so the kernel
    # never runs lane-sparse (masked-store penalty).
    if De <= 128:
        De_p = next(d for d in _DIVISORS_128 if d >= De)
        pack = 128 // De_p
    else:
        De_p, pack = De, 1

    w1c = w1[2 * D:].astype(jnp.float32)                 # (De, H) edge part of W1
    w2f, b2f = w2.astype(jnp.float32), b2.astype(jnp.float32)
    gf, bf = gamma.astype(jnp.float32), beta.astype(jnp.float32)
    if De_p != De:
        pad = De_p - De
        edge_attr = jnp.pad(edge_attr, ((0, 0), (0, pad)))
        w1c = jnp.pad(w1c, ((0, pad), (0, 0)))
        w2f = jnp.pad(w2f, ((0, 0), (0, pad)))
        b2f = jnp.pad(b2f, (0, pad))
        gf = jnp.pad(gf, (0, pad))
        bf = jnp.pad(bf, (0, pad))

    # ---- pack edges with a *free* row-major reshape; no dtype pre-pass (bf16
    # cast happens inside the kernel).  Only a tiny pad when E % pack != 0.
    if E % pack:
        padn = pack - E % pack
        x_i = jnp.pad(x_i, ((0, padn), (0, 0)))
        x_j = jnp.pad(x_j, ((0, padn), (0, 0)))
        edge_attr = jnp.pad(edge_attr, ((0, padn), (0, 0)))
    E_pk = x_i.shape[0]
    rows = E_pk // pack
    xi_p = x_i.reshape(rows, pack * D)
    xj_p = x_j.reshape(rows, pack * D)
    ea_p = edge_attr.reshape(rows, pack * De_p)

    # ---- block-diagonal weights (built once; in a real model these are cached).
    eye = jnp.eye(pack, dtype=jnp.float32)
    w1f = w1.astype(jnp.float32)
    # x_i and x_j parts stacked -> single K = 2*pack*D operand in the kernel.
    w1ab_blk = jnp.concatenate([jnp.kron(eye, w1f[:D]),
                                jnp.kron(eye, w1f[D:2 * D])],
                               axis=0).astype(jnp.bfloat16)          # (2*pack*D, pack*H)
    w1c_blk = jnp.kron(eye, w1c).astype(jnp.bfloat16)                # (pack*De_p, pack*H)
    w2_blk = jnp.kron(eye, w2f).astype(jnp.bfloat16)                 # (pack*H, pack*De_p)
    # LN segment-average matrix: only the first De lanes of each segment carry
    # real features (1/De is exactly representable in bf16 when De is a power of 2).
    avg = jnp.zeros((De_p, De_p), jnp.float32).at[:De, :De].set(1.0 / De)
    pavg_blk = jnp.kron(eye, avg).astype(jnp.bfloat16)               # (pack*De_p, pack*De_p)

    b1_blk = jnp.tile(b1.astype(jnp.float32), pack).reshape(1, pack * H)
    b2_blk = jnp.tile(b2f, pack).reshape(1, pack * De_p)
    g_blk = jnp.tile(gf, pack).reshape(1, pack * De_p)
    beta_blk = jnp.tile(bf, pack).reshape(1, pack * De_p)

    # ---- tile size: big enough to amortise ~0.35us/grid-step overhead, clamped
    # so the grid keeps >= 2 steps when there's enough work (v7x: 2 TensorCores).
    step_r = 8
    tile_r = max(step_r, (max(tile_e, pack) // pack) // step_r * step_r)
    if rows >= 2 * step_r:
        half_r = pl.cdiv(pl.cdiv(rows, 2), step_r) * step_r
        tile_r = min(tile_r, half_r)
    tile_r = max(step_r, min(tile_r, pl.cdiv(rows, step_r) * step_r))
    grid = (pl.cdiv(rows, tile_r),)   # ragged last block handled by Pallas, not jnp.pad

    def stream_spec(width):
        # TODO(synk): add pipeline_mode=pl.Buffered(3) here if a profile still
        # shows exposed DMA on the streaming operands after the big-tile change.
        return pl.BlockSpec((tile_r, width), lambda i: (i, 0))

    def const_spec(shape):
        return pl.BlockSpec(shape, lambda i: (0, 0))

    isz = lambda a: jnp.dtype(a.dtype).itemsize
    K1 = 2 * pack * D + pack * De_p
    cost = pl.CostEstimate(
        # Actually-issued MXU work (kron-inflated by pack, plus the two LN dots).
        flops=int(2 * rows * (K1 * pack * H
                              + pack * H * pack * De_p
                              + 2 * (pack * De_p) ** 2)),
        transcendentals=int(rows * (pack * H + pack * De_p)),
        bytes_accessed=int(rows * (pack * D * (isz(xi_p) + isz(xj_p))
                                   + pack * De_p * (isz(ea_p)
                                                    + jnp.dtype(out_dtype).itemsize))
                           + (w1ab_blk.size + w1c_blk.size + w2_blk.size
                              + pavg_blk.size) * 2
                           + (b1_blk.size + b2_blk.size + g_blk.size
                              + beta_blk.size) * 4),
    )

    out_p = pl.pallas_call(
        _edge_processor_kernel,
        out_shape=jax.ShapeDtypeStruct((rows, pack * De_p), out_dtype),
        grid_spec=pltpu.PrefetchScalarGridSpec(
            num_scalar_prefetch=0,
            grid=grid,
            in_specs=[
                stream_spec(pack * D),                      # x_i (packed)
                stream_spec(pack * D),                      # x_j (packed)
                stream_spec(pack * De_p),                   # edge_attr (packed)
                const_spec((2 * pack * D, pack * H)),       # W1 (x_i|x_j) block-diag
                const_spec((pack * De_p, pack * H)),        # W1 (edge) block-diag
                const_spec((1, pack * H)),                  # b1
                const_spec((pack * H, pack * De_p)),        # W2 block-diag
                const_spec((1, pack * De_p)),               # b2
                const_spec((pack * De_p, pack * De_p)),     # LN segment-average matrix
                const_spec((1, pack * De_p)),               # gamma
                const_spec((1, pack * De_p)),               # beta
            ],
            out_specs=stream_spec(pack * De_p),
        ),
        compiler_params=pltpu.CompilerParams(
            dimension_semantics=("parallel",)),
        cost_estimate=cost,
    )(xi_p, xj_p, ea_p, w1ab_blk, w1c_blk, b1_blk,
      w2_blk, b2_blk, pavg_blk, g_blk, beta_blk)

    # Unpack (free row-major reshape); drop pack-padding rows / De-padding lanes.
    out = out_p.reshape(E_pk, De_p)
    if De_p != De:
        out = out[:, :De]
    return out[:E]


def init_params(key, dims):
    """dims = [in_dim, hidden, out_dim] for the edge MLP (as in EdgeProcessor)."""
    d_in, d_h, d_out = dims
    k1, k2, k3, k4, k5, k6 = jax.random.split(key, 6)
    w1 = jax.random.uniform(k1, (d_in, d_h), jnp.float32, -1.0, 1.0) / jnp.sqrt(d_in)
    b1 = jax.random.uniform(k2, (d_h,), jnp.float32, -0.1, 0.1)
    w2 = jax.random.uniform(k3, (d_h, d_out), jnp.float32, -1.0, 1.0) / jnp.sqrt(d_h)
    b2 = jax.random.uniform(k4, (d_out,), jnp.float32, -0.1, 0.1)
    gamma = 1.0 + 0.1 * jax.random.normal(k5, (d_out,), jnp.float32)
    beta = 0.1 * jax.random.normal(k6, (d_out,), jnp.float32)
    return dict(w1=w1, b1=b1, w2=w2, b2=b2, gamma=gamma, beta=beta)


def edge_processor_ref(x_i, x_j, edge_attr, p):
    """Pure-JAX f32 reference matching the PyTorch module."""
    out = jnp.concatenate([x_i, x_j, edge_attr], axis=-1)
    h = out @ p["w1"] + p["b1"]
    h = h * jax.nn.sigmoid(h)
    y = h @ p["w2"] + p["b2"]
    mean = jnp.mean(y, axis=-1, keepdims=True)
    var = jnp.mean((y - mean) ** 2, axis=-1, keepdims=True)
    yn = (y - mean) / jnp.sqrt(var + LN_EPS)
    yn = yn * p["gamma"] + p["beta"]
    return edge_attr + yn


def edge_processor_ref_matched(x_i, x_j, edge_attr, p):
    """Reference mirroring the kernel's bf16-operand / f32-accumulate matmuls
    (including the bf16 MXU LayerNorm statistics)."""
    D = x_i.shape[-1]
    De = edge_attr.shape[-1]
    w1 = p["w1"].astype(jnp.bfloat16)
    w2 = p["w2"].astype(jnp.bfloat16)
    x = jnp.concatenate([x_i, x_j], axis=-1).astype(jnp.bfloat16)
    h = (jnp.dot(x, w1[:2 * D], preferred_element_type=jnp.float32)
         + jnp.dot(edge_attr.astype(jnp.bfloat16), w1[2 * D:],
                   preferred_element_type=jnp.float32)
         + p["b1"])
    h = h * jax.nn.sigmoid(h)
    y = jnp.dot(h.astype(jnp.bfloat16), w2, preferred_element_type=jnp.float32) + p["b2"]
    avg = jnp.full((De, De), 1.0 / De, jnp.float32).astype(jnp.bfloat16)
    mu = jnp.dot(y.astype(jnp.bfloat16), avg, preferred_element_type=jnp.float32)
    c = y - mu
    var = jnp.dot((c * c).astype(jnp.bfloat16), avg, preferred_element_type=jnp.float32)
    yn = c * (p["gamma"] * jax.lax.rsqrt(var + LN_EPS)) + p["beta"]
    return edge_attr.astype(jnp.float32) + yn


if __name__ == "__main__":
    key = jax.random.PRNGKey(0)
    # Small shapes; E is deliberately not a multiple of the tile so the Pallas
    # partial-last-block path (no wrapper-side padding) is exercised.
    E, D, De, H = 1000, 32, 32, 64
    dims = [2 * D + De, H, De]             # EdgeProcessor dims

    kx, ky, ke, kp = jax.random.split(key, 4)
    x_i = jax.random.normal(kx, (E, D), jnp.float32)
    x_j = jax.random.normal(ky, (E, D), jnp.float32)
    edge_attr = jax.random.normal(ke, (E, De), jnp.float32)
    params = init_params(kp, dims)

    # Small tile here so the grid has several blocks even at this small E
    # (feeds both v7x TensorCores); production default is tile_e=4096.
    out = edge_processor(x_i, x_j, edge_attr, params, tile_e=1024)
    out = jax.block_until_ready(out)
    assert out.shape == (E, De)
    assert bool(jnp.all(jnp.isfinite(out)))

    # Tight check against a reference with matched (bf16 operand, f32 accumulate)
    # matmul precision -- validates the kernel math itself.
    ref_m = edge_processor_ref_matched(x_i, x_j, edge_attr, params)
    assert jnp.allclose(out, ref_m, atol=2e-2, rtol=2e-2), "mismatch vs matched-precision reference"

    # Loose sanity check against the pure-f32 PyTorch-equivalent reference
    # (differences are only bf16 operand rounding in the matmuls / LN stats).
    ref = edge_processor_ref(x_i, x_j, edge_attr, params)
    assert jnp.allclose(out, ref, atol=0.3, rtol=0.1), "mismatch vs f32 reference"

    print("KERNEL_OK")
</pallas_src>

<mosaic_0001>
module attributes {stable_mosaic.version = 11 : i64} {
  func.func @_edge_processor_kernel(%arg0: i32, %arg1: memref<128x128xf32, #tpu.memory_space<vmem>>, %arg2: memref<128x128xf32, #tpu.memory_space<vmem>>, %arg3: memref<128x128xf32, #tpu.memory_space<vmem>>, %arg4: memref<256x256xbf16, #tpu.memory_space<vmem>>, %arg5: memref<128x256xbf16, #tpu.memory_space<vmem>>, %arg6: memref<1x256xf32, #tpu.memory_space<vmem>>, %arg7: memref<256x128xbf16, #tpu.memory_space<vmem>>, %arg8: memref<1x128xf32, #tpu.memory_space<vmem>>, %arg9: memref<128x128xbf16, #tpu.memory_space<vmem>>, %arg10: memref<1x128xf32, #tpu.memory_space<vmem>>, %arg11: memref<1x128xf32, #tpu.memory_space<vmem>>, %arg12: memref<128x128xf32, #tpu.memory_space<vmem>>) attributes {dimension_semantics = [#tpu.dimension_semantics<parallel>], iteration_bounds = array<i64: 2>, scalar_prefetch = 0 : i64, scratch_operands = 0 : i64, tpu.core_type = #tpu.core_type<tc>, window_params = [{transform_indices = @transform_0, window_bounds = array<i64: 128, 128>}, {transform_indices = @transform_1, window_bounds = array<i64: 128, 128>}, {transform_indices = @transform_2, window_bounds = array<i64: 128, 128>}, {pipeline_mode = #tpu.pipeline_mode<synchronous>, transform_indices = @transform_3, window_bounds = array<i64: 256, 256>}, {pipeline_mode = #tpu.pipeline_mode<synchronous>, transform_indices = @transform_4, window_bounds = array<i64: 128, 256>}, {pipeline_mode = #tpu.pipeline_mode<synchronous>, transform_indices = @transform_5, window_bounds = array<i64: 1, 256>}, {pipeline_mode = #tpu.pipeline_mode<synchronous>, transform_indices = @transform_6, window_bounds = array<i64: 256, 128>}, {pipeline_mode = #tpu.pipeline_mode<synchronous>, transform_indices = @transform_7, window_bounds = array<i64: 1, 128>}, {pipeline_mode = #tpu.pipeline_mode<synchronous>, transform_indices = @transform_8, window_bounds = array<i64: 128, 128>}, {pipeline_mode = #tpu.pipeline_mode<synchronous>, transform_indices = @transform_9, window_bounds = array<i64: 1, 128>}, {pipeline_mode = #tpu.pipeline_mode<synchronous>, transform_indices = @transform_10, window_bounds = array<i64: 1, 128>}, {transform_indices = @transform_11, window_bounds = array<i64: 128, 128>}]} {
    %c0 = arith.constant 0 : index
    %c0_0 = arith.constant 0 : index
    %0 = vector.load %arg3[%c0, %c0_0] : memref<128x128xf32, #tpu.memory_space<vmem>>, vector<128x128xf32>
    %c0_1 = arith.constant 0 : index
    %c0_2 = arith.constant 0 : index
    %1 = vector.load %arg1[%c0_1, %c0_2] : memref<128x128xf32, #tpu.memory_space<vmem>>, vector<128x128xf32>
    %2 = arith.truncf %1 : vector<128x128xf32> to vector<128x128xbf16>
    %c0_3 = arith.constant 0 : index
    %c0_4 = arith.constant 0 : index
    %3 = vector.load %arg2[%c0_3, %c0_4] : memref<128x128xf32, #tpu.memory_space<vmem>>, vector<128x128xf32>
    %4 = arith.truncf %3 : vector<128x128xf32> to vector<128x128xbf16>
    %5 = tpu.concatenate %2, %4 in 1 : vector<128x128xbf16>, vector<128x128xbf16> -> vector<128x256xbf16>
    %c0_5 = arith.constant 0 : index
    %c0_6 = arith.constant 0 : index
    %6 = vector.load %arg4[%c0_5, %c0_6] : memref<256x256xbf16, #tpu.memory_space<vmem>>, vector<256x256xbf16>
    %cst = arith.constant dense<0.000000e+00> : vector<128x256xf32>
    %7 = tpu.matmul %5, %6, %cst {dimension_numbers = #tpu.dot_dimension_numbers<[1], [0], [0], [1], [0, 0, 1, 1], [], []>} : vector<128x256xbf16>, vector<256x256xbf16>, vector<128x256xf32> -> vector<128x256xf32>
    %8 = arith.truncf %0 : vector<128x128xf32> to vector<128x128xbf16>
    %c0_7 = arith.constant 0 : index
    %c0_8 = arith.constant 0 : index
    %9 = vector.load %arg5[%c0_7, %c0_8] : memref<128x256xbf16, #tpu.memory_space<vmem>>, vector<128x256xbf16>
    %cst_9 = arith.constant dense<0.000000e+00> : vector<128x256xf32>
    %10 = tpu.matmul %8, %9, %cst_9 {dimension_numbers = #tpu.dot_dimension_numbers<[1], [0], [0], [1], [0, 0, 1, 1], [], []>} : vector<128x128xbf16>, vector<128x256xbf16>, vector<128x256xf32> -> vector<128x256xf32>
    %11 = arith.addf %7, %10 : vector<128x256xf32>
    %c0_10 = arith.constant 0 : index
    %c0_11 = arith.constant 0 : index
    %12 = vector.load %arg6[%c0_10, %c0_11] : memref<1x256xf32, #tpu.memory_space<vmem>>, vector<1x256xf32>
    %13 = vector.broadcast %12 : vector<1x256xf32> to vector<128x256xf32>
    %14 = arith.addf %11, %13 : vector<128x256xf32>
    %15 = arith.negf %14 : vector<128x256xf32>
    %16 = math.exp %15 : vector<128x256xf32>
    %cst_12 = arith.constant 1.000000e+00 : f32
    %17 = vector.broadcast %cst_12 : f32 to vector<128x256xf32>
    %18 = arith.addf %17, %16 : vector<128x256xf32>
    %19 = arith.divf %17, %18 : vector<128x256xf32>
    %20 = arith.mulf %14, %19 : vector<128x256xf32>
    %21 = arith.truncf %20 : vector<128x256xf32> to vector<128x256xbf16>
    %c0_13 = arith.constant 0 : index
    %c0_14 = arith.constant 0 : index
    %22 = vector.load %arg7[%c0_13, %c0_14] : memref<256x128xbf16, #tpu.memory_space<vmem>>, vector<256x128xbf16>
    %cst_15 = arith.constant dense<0.000000e+00> : vector<128x128xf32>
    %23 = tpu.matmul %21, %22, %cst_15 {dimension_numbers = #tpu.dot_dimension_numbers<[1], [0], [0], [1], [0, 0, 1, 1], [], []>} : vector<128x256xbf16>, vector<256x128xbf16>, vector<128x128xf32> -> vector<128x128xf32>
    %c0_16 = arith.constant 0 : index
    %c0_17 = arith.constant 0 : index
    %24 = vector.load %arg8[%c0_16, %c0_17] : memref<1x128xf32, #tpu.memory_space<vmem>>, vector<1x128xf32>
    %25 = vector.broadcast %24 : vector<1x128xf32> to vector<128x128xf32>
    %26 = arith.addf %23, %25 : vector<128x128xf32>
    %27 = arith.truncf %26 : vector<128x128xf32> to vector<128x128xbf16>
    %c0_18 = arith.constant 0 : index
    %c0_19 = arith.constant 0 : index
    %28 = vector.load %arg9[%c0_18, %c0_19] : memref<128x128xbf16, #tpu.memory_space<vmem>>, vector<128x128xbf16>
    %cst_20 = arith.constant dense<0.000000e+00> : vector<128x128xf32>
    %29 = tpu.matmul %27, %28, %cst_20 {dimension_numbers = #tpu.dot_dimension_numbers<[1], [0], [0], [1], [0, 0, 1, 1], [], []>} : vector<128x128xbf16>, vector<128x128xbf16>, vector<128x128xf32> -> vector<128x128xf32>
    %30 = arith.subf %26, %29 : vector<128x128xf32>
    %31 = arith.mulf %30, %30 : vector<128x128xf32>
    %32 = arith.truncf %31 : vector<128x128xf32> to vector<128x128xbf16>
    %c0_21 = arith.constant 0 : index
    %c0_22 = arith.constant 0 : index
    %33 = vector.load %arg9[%c0_21, %c0_22] : memref<128x128xbf16, #tpu.memory_space<vmem>>, vector<128x128xbf16>
    %cst_23 = arith.constant dense<0.000000e+00> : vector<128x128xf32>
    %34 = tpu.matmul %32, %33, %cst_23 {dimension_numbers = #tpu.dot_dimension_numbers<[1], [0], [0], [1], [0, 0, 1, 1], [], []>} : vector<128x128xbf16>, vector<128x128xbf16>, vector<128x128xf32> -> vector<128x128xf32>
    %c0_24 = arith.constant 0 : index
    %c0_25 = arith.constant 0 : index
    %35 = vector.load %arg10[%c0_24, %c0_25] : memref<1x128xf32, #tpu.memory_space<vmem>>, vector<1x128xf32>
    %cst_26 = arith.constant 9.99999974E-6 : f32
    %36 = vector.broadcast %cst_26 : f32 to vector<128x128xf32>
    %37 = arith.addf %34, %36 : vector<128x128xf32>
    %38 = math.rsqrt %37 : vector<128x128xf32>
    %39 = vector.broadcast %35 : vector<1x128xf32> to vector<128x128xf32>
    %40 = arith.mulf %39, %38 : vector<128x128xf32>
    %41 = arith.mulf %30, %40 : vector<128x128xf32>
    %c0_27 = arith.constant 0 : index
    %c0_28 = arith.constant 0 : index
    %42 = vector.load %arg11[%c0_27, %c0_28] : memref<1x128xf32, #tpu.memory_space<vmem>>, vector<1x128xf32>
    %43 = vector.broadcast %42 : vector<1x128xf32> to vector<128x128xf32>
    %44 = arith.addf %41, %43 : vector<128x128xf32>
    %45 = arith.addf %0, %44 : vector<128x128xf32>
    %c0_29 = arith.constant 0 : index
    %c0_30 = arith.constant 0 : index
    %46 = vector.load %arg12[%c0_29, %c0_30] : memref<128x128xf32, #tpu.memory_space<vmem>>, vector<128x128xf32>
    tpu.vector_store %arg12[%c0_29, %c0_30], %45 {strides = array<i32>} : memref<128x128xf32, #tpu.memory_space<vmem>>, vector<128x128xf32>,
    return
  }
  func.func @transform_0(%arg0: i32) -> (i32, i32) {
    %c0_i32 = arith.constant 0 : i32
    %c0_i32_0 = arith.constant 0 : i32
    return %arg0, %c0_i32 : i32, i32
  }
  func.func @transform_1(%arg0: i32) -> (i32, i32) {
    %c0_i32 = arith.constant 0 : i32
    %c0_i32_0 = arith.constant 0 : i32
    return %arg0, %c0_i32 : i32, i32
  }
  func.func @transform_2(%arg0: i32) -> (i32, i32) {
    %c0_i32 = arith.constant 0 : i32
    %c0_i32_0 = arith.constant 0 : i32
    return %arg0, %c0_i32 : i32, i32
  }
  func.func @transform_3(%arg0: i32) -> (i32, i32) {
    %c0_i32 = arith.constant 0 : i32
    %c0_i32_0 = arith.constant 0 : i32
    %c0_i32_1 = arith.constant 0 : i32
    return %c0_i32, %c0_i32_0 : i32, i32
  }
  func.func @transform_4(%arg0: i32) -> (i32, i32) {
    %c0_i32 = arith.constant 0 : i32
    %c0_i32_0 = arith.constant 0 : i32
    %c0_i32_1 = arith.constant 0 : i32
    return %c0_i32, %c0_i32_0 : i32, i32
  }
  func.func @transform_5(%arg0: i32) -> (i32, i32) {
    %c0_i32 = arith.constant 0 : i32
    %c0_i32_0 = arith.constant 0 : i32
    %c0_i32_1 = arith.constant 0 : i32
    return %c0_i32, %c0_i32_0 : i32, i32
  }
  func.func @transform_6(%arg0: i32) -> (i32, i32) {
    %c0_i32 = arith.constant 0 : i32
    %c0_i32_0 = arith.constant 0 : i32
    %c0_i32_1 = arith.constant 0 : i32
    return %c0_i32, %c0_i32_0 : i32, i32
  }
  func.func @transform_7(%arg0: i32) -> (i32, i32) {
    %c0_i32 = arith.constant 0 : i32
    %c0_i32_0 = arith.constant 0 : i32
    %c0_i32_1 = arith.constant 0 : i32
    return %c0_i32, %c0_i32_0 : i32, i32
  }
  func.func @transform_8(%arg0: i32) -> (i32, i32) {
    %c0_i32 = arith.constant 0 : i32
    %c0_i32_0 = arith.constant 0 : i32
    %c0_i32_1 = arith.constant 0 : i32
    return %c0_i32, %c0_i32_0 : i32, i32
  }
  func.func @transform_9(%arg0: i32) -> (i32, i32) {
    %c0_i32 = arith.constant 0 : i32
    %c0_i32_0 = arith.constant 0 : i32
    %c0_i32_1 = arith.constant 0 : i32
    return %c0_i32, %c0_i32_0 : i32, i32
  }
  func.func @transform_10(%arg0: i32) -> (i32, i32) {
    %c0_i32 = arith.constant 0 : i32
    %c0_i32_0 = arith.constant 0 : i32
    %c0_i32_1 = arith.constant 0 : i32
    return %c0_i32, %c0_i32_0 : i32, i32
  }
  func.func @transform_11(%arg0: i32) -> (i32, i32) {
    %c0_i32 = arith.constant 0 : i32
    %c0_i32_0 = arith.constant 0 : i32
    return %arg0, %c0_i32 : i32, i32
  }
}

</mosaic_0001>

<bundles_post_ra>
// kernel: tpu_custom_call.1
= control target key start
LH: loop header
LB: loop body
LE: loop exit
PB: predicated region body
PF: predicated region fallthrough
CT: control target
= control target key end

     0   :  { %s4180_s0 = inlined_call_operand.hbm [shape: f32[250,128], index: 0, kind: input, shape index: {}]   ;;  %s4181_s1 = inlined_call_operand.hbm [shape: f32[250,128], index: 1, kind: input, shape index: {}]   ;;  %s4182_s2 = inlined_call_operand.hbm [shape: f32[250,128], index: 2, kind: input, shape index: {}]   ;;  %s4183_s3 = inlined_call_operand.hbm [shape: bf16[256,256], index: 3, kind: input, shape index: {}]   ;;  %s4184_s4 = inlined_call_operand.hbm [shape: bf16[128,256], index: 4, kind: input, shape index: {}]   ;;  %s4185_s5 = inlined_call_operand.vmem [shape: f32[1,256], index: 5, kind: input, shape index: {}]   ;;  %s4186_s6 = inlined_call_operand.hbm [shape: bf16[256,128], index: 6, kind: input, shape index: {}]   ;;  %s4187_s7 = inlined_call_operand.vmem [shape: f32[1,128], index: 7, kind: input, shape index: {}]   ;;  %s4188_s8 = inlined_call_operand.hbm [shape: bf16[128,128], index: 8, kind: input, shape index: {}]   ;;  %s4189_s9 = inlined_call_operand.vmem [shape: f32[1,128], index: 9, kind: input, shape index: {}]   ;;  %s4190_s10 = inlined_call_operand.vmem [shape: f32[1,128], index: 10, kind: input, shape index: {}]   ;;  %s4191_s11 = inlined_call_operand.hbm [shape: f32[250,128], index: 11, kind: output, shape index: {}]  }
   0x1   :  { %4219 = sst [smem:[#allocation26_spill]] %s4181_s1 }
   0x2   :  { %4220 = sst [smem:[#allocation27_spill]] %s4183_s3 }
   0x3   :  { %4221 = sst [smem:[#allocation28_spill]] %s4186_s6 }
   0x4   :  { %4222 = sst [smem:[#allocation29_spill]] %s4187_s7 }
   0x5   :  { %4223 = sst [smem:[#allocation30_spill]] %s4189_s9 }
   0x6   :  { %4224 = sst [smem:[#allocation31_spill]] %s4190_s10 }
   0x7   :  { %4225 = sst [smem:[#allocation32_spill]] %s4191_s11 }
   0x8   :  { %16 = vsyncpa [#allocation3], 0 }
   0x9   :  { %18 = vsyncpa [#allocation3 + $0x1], 0 }
   0xa   :  { %19 = vsyncpa [#allocation6], 0 }
   0xb   :  { %21 = vsyncpa [#allocation6 + $0x1], 0 }
   0xc   :  { %22 = vsyncpa [#allocation9], 0 }
   0xd   :  { %23 = vsyncpa [#allocation12], 0 }
   0xe   :  { %24 = vsyncpa [#allocation4], 0 }
   0xf   :  { %26 = vsyncpa [#allocation4 + $0x1], 0  ;;  %s3297_s17 = smov 0   ;;  %s3299_s18 = smov 0  }
  0x10   :  { %s3301_s19 = smov 0   ;;  %s3303_s20 = smov 0  }
  0x11 LB: > { %4226 = sst [smem:[#allocation20_spill]] %s3208_s17  ;;  %s3318_s21 = sadd.s32 4294967295, %s3220_s20   ;;  %s3220_s20 = sphi %s3303_s20, %s4270_s20   ;;  %s3216_s19 = sphi %s3301_s19, %s4274_s19   ;;  %s3212_s18 = sphi %s3299_s18, %s4273_s18   ;;  %s3208_s17 = sphi %s3297_s17, %s4272_s17  }
  0x12   : > { %4227 = sst [smem:[#allocation21_spill]] %s3220_s20  ;;  %s2231_s22 = sadd.s32 4294967294, %s3220_s20  }
  0x13   : > { %p52_p0 = scmp.ne.s32.totalorder %s3212_s18, %s3208_s17  ;;  %p4192_p1 = scmp.eq.s32.totalorder %s3318_s21, 0 }
  0x14   : > { %p302_p3 = scmp.eq.s32.totalorder %s2231_s22, 1  ;;  %p2232_p5 = scmp.ge.s32.totalorder %s3220_s20, 1 }
  0x15   : > { %p3327_p4 = por %p4192_p1, %p52_p0  ;;  %p309_p7 = scmp.lt.s32.totalorder %s3220_s20, 3 }
  0x16   : > { %p3332_p6 = por %p302_p3, %p52_p0  ;;  %s3222_s26 = smov [#allocation8]  }
  0x17   : > { %s4228_s23 = scalar_select %p3327_p4, 1, 0 }
  0x18   : > { %s4229_s24 = scalar_select %p3332_p6, 1, 0 }
  0x19   : > { %p3337_p8 = pnand %p2232_p5, %p309_p7  ;;  %s321_s27 = sshll.u32 %s3222_s26, 4  ;;  %s3341_s27 = int_to_ptr.vmem [resolvable:$true] %s321_s27 }
  0x1a   : > { %4230 = sst [smem:[#allocation22_spill]] %s4229_s24  ;;  %s3223_s29 = smov [#allocation11]  }
  0x1b   : > { %s4231_s25 = scalar_select %p3337_p8, 1, 0 }
  0x1c   : > { %p2588_p9 = pneg %p3337_p8  ;;  %s350_s30 = sshll.u32 %s3223_s29, 4  ;;  %s3352_s30 = int_to_ptr.vmem [resolvable:$true] %s350_s30 }
  0x1d   : > { %s4233_s3 = sld [smem:[#allocation27_spill]] }
  0x1e   : > { %p3348_p11 = pnand %p2588_p9, %p4192_p1 }
  0x20   : > { %s4232_s28 = scalar_select %p3348_p11, 1, 0 }
  0x21   : > { %p3362_p13 = pneg %p3348_p11 }
  0x23   : > { %s2940_s14 = scalar_lea.hbm %s4233_s3, 4096 }
  0x24   : > { %p2941_p12 = scmp.ne.s32.totalorder %s4233_s3, %s2940_s14  ;;  %p2947_p5 = scmp.lt.u32.totalorder %s2940_s14, %s4233_s3 }
  0x25   : > { %s4234_s22 = scalar_select %p3362_p13, 1, 0 }
  0x26   : > { %p2943_p0 = pnand %p3362_p13, %p2941_p12 }
  0x28   : > { %p2944_p3 = pneg %p2943_p0 }
  0x2a   : > { %p2949_p7 = pnand %p2947_p5, %p2944_p3 }
  0x2c   : > { %2952 = shalt.err (!%p2949_p7)
}
  0x2d   : > { %s2953_s12 = scalar_lea.vmem %s3341_s27, 4096  ;;  %p2961_p2 = scmp.lt.s32.totalorder %s3341_s27, %s3341_s27 }
  0x2e   : > { %p2954_p9 = scmp.ne.s32.totalorder %s3341_s27, %s2953_s12  ;;  %p2962_p6 = scmp.lt.s32.totalorder %s2953_s12, %s2953_s12 }
  0x30   : > { %p2956_p10 = pnand %p2954_p9, %p3362_p13  ;;  %p2963_p12 = por %p2962_p6, %p2961_p2 }
  0x32   : > { %p2957_p1 = pneg %p2956_p10 }
  0x34   : > { %p2964_p0 = pnand %p2963_p12, %p2957_p1 }
  0x36   : > { %2967 = shalt.err (!%p2964_p0)
}
  0x37   : > { %s4199_s13 = smov 128   ;;  %s4201_s14 = smov 8  }
  0x38   : > { %2591 = dma.hbm_to_vmem [thread:$0]  (!%p3348_p11), %s4233_s3, 4096, %s3341_s27, [#allocation9], %s4199_s13, %s4199_s13, %s4201_s14  }
  0x39   : > { %s4235_s6 = sld [smem:[#allocation28_spill]] }
  0x3f   : > { %s2968_s12 = scalar_lea.hbm %s4235_s6, 2048 }
  0x40   : > { %p2969_p1 = scmp.ne.s32.totalorder %s4235_s6, %s2968_s12  ;;  %p2975_p10 = scmp.lt.u32.totalorder %s2968_s12, %s4235_s6 }
  0x42   : > { %p2971_p2 = pnand %p2969_p1, %p3362_p13 }
  0x44   : > { %p2972_p6 = pneg %p2971_p2 }
  0x46   : > { %p2977_p3 = pnand %p2975_p10, %p2972_p6 }
  0x48   : > { %2980 = shalt.err (!%p2977_p3)
}
  0x49   : > { %s2981_s27 = scalar_lea.vmem %s3352_s30, 2048  ;;  %p2989_p12 = scmp.lt.s32.totalorder %s3352_s30, %s3352_s30 }
  0x4a   : > { %p2982_p5 = scmp.ne.s32.totalorder %s3352_s30, %s2981_s27  ;;  %p2990_p0 = scmp.lt.s32.totalorder %s2981_s27, %s2981_s27 }
  0x4c   : > { %p2984_p7 = pnand %p2982_p5, %p3362_p13  ;;  %p2991_p1 = por %p2990_p0, %p2989_p12 }
  0x4e   : > { %p2985_p9 = pneg %p2984_p7 }
  0x50   : > { %p2992_p2 = pnand %p2991_p1, %p2985_p9 }
  0x52   : > { %2995 = shalt.err (!%p2992_p2)
}
  0x53   : > { %s4196_s17 = smov 64   ;;  %s4197_s10 = smov 4  }
  0x54   : > { %2597 = dma.hbm_to_vmem [thread:$0]  (!%p3348_p11), %s4235_s6, 2048, %s3352_s30, [#allocation12], %s4196_s17, %s4196_s17, %s4197_s10  }
  0x55   : > { %s3413_s15 = sadd.s32 1, %s3220_s20   ;;  %s39_s26 = sadd.s32 1, %s3216_s19 }
  0x56   : > { %4236 = sst [smem:[#allocation23_spill]] %s3413_s15  ;;  %s36_s16 = ssub.s32 %s3220_s20, %s3413_s15 }
  0x57   : > { %p37_p6 = scmp.eq.s32.totalorder %s36_s16, 0  ;;  %p46_p10 = scmp.ne.s32.totalorder %s3216_s19, %s3212_s18 }
  0x58   : > { %p47_p3 = scmp.eq.s32.totalorder %s3220_s20, 0  ;;  %p4238_p7 = scmp.eq.s32.totalorder %s3318_s21, 1 }
  0x59   : > { %s3422_s29 = scalar_select %p37_p6, %s3216_s19, %s39_s26  }
  0x5a   : > { %p48_p5 = por %p47_p3, %p46_p10  ;;  %p3426_p9 = por %p4238_p7, %p46_p10 }
  0x5b   : > { %4237 = sst [smem:[#allocation24_spill]] %s3422_s29  ;;  %p2619_p12 = scmp.lt.s32.totalorder %s3220_s20, 2 }
  0x5c   : > { %s4239_s12 = scalar_select %p3426_p9, 1, 0 }
  0x5d   : > { %s4198_s27 = sand.u32 1, %s3216_s19   ;;  %s3437_s11 = sshll.u32 %s3220_s20, 11 }
  0x5e   : > { %4240 = sst [smem:[#allocation25_spill]] %s4239_s12  ;;  %s3434_s30 = sshll.u32 %s4198_s27, 7 }
  0x5f   : > { %p3439_p0 = pnand %p2619_p12, %p48_p5  ;;  %s407_s16 = sand.u32 1, %s3220_s20  }
  0x60   : > { %s4242_s1 = sld [smem:[#allocation26_spill]]  ;;  %s411_s27 = scalar_lea.vmem [#allocation5], %s3434_s30 }
  0x61   : > { %s4241_s24 = scalar_select %p3439_p0, 1, 0 }
  0x62   : > { %s418_s13 = sshll.u32 %s411_s27, 4  ;;  %s3228_s14 = smov [#allocation10]   ;;  %s3451_s13 = int_to_ptr.vmem [resolvable:$true] %s418_s13 }
  0x63   : > { %s3453_s3 = sshll.u32 %s3228_s14, 4  ;;  %s3455_s6 = scalar_lea.sflag [#allocation6], %s407_s16  ;;  %s335_s3 = int_to_ptr.vmem [resolvable:$true] %s3453_s3 }
  0x64   : > { %p3461_p2 = pneg %p3439_p0 }
  0x66   : > { %s3448_s10 = scalar_lea.hbm %s4242_s1, %s3437_s11  ;;  %s3001_s15 = scalar_lea.hbm %s4242_s1, 4096 }
  0x67   : > { %s2996_s29 = scalar_lea.hbm %s3448_s10, 2048  ;;  %p3002_p3 = scmp.lt.u32.totalorder %s3448_s10, %s4242_s1 }
  0x68   : > { %p2997_p1 = scmp.ne.s32.totalorder %s3448_s10, %s2996_s29  ;;  %p3003_p5 = scmp.lt.u32.totalorder %s3001_s15, %s2996_s29 }
  0x69   : > { %s4243_s17 = scalar_select %p3461_p2, 1, 0 }
  0x6a   : > { %p2999_p6 = pnand %p3461_p2, %p2997_p1  ;;  %p3004_p7 = por %p3003_p5, %p3002_p3 }
  0x6b   : > { %p3005_p12 = scmp.lt.u32.totalorder %s2996_s29, %s3448_s10 }
  0x6c   : > { %p3000_p10 = pneg %p2999_p6 }
  0x6d   : > { %p3006_p9 = por %p3005_p12, %p3004_p7 }
  0x6f   : > { %p3007_p4 = pnand %p3006_p9, %p3000_p10 }
  0x71   : > { %3010 = shalt.err (!%p3007_p4)
}
  0x72   : > { %s3011_s16 = scalar_lea.vmem %s3451_s13, 2048  ;;  %s3229_s26 = smov [#allocation5]  }
  0x73   : > { %p3012_p1 = scmp.ne.s32.totalorder %s3451_s13, %s3011_s16  ;;  %s3016_s27 = sshll.u32 %s3229_s26, 4  ;;  %s3017_s27 = int_to_ptr.vmem [resolvable:$false] %s3016_s27 }
  0x74   : > { %s3018_s20 = scalar_lea.vmem %s3017_s27, 4096  ;;  %p3019_p11 = scmp.lt.s32.totalorder %s3451_s13, %s3017_s27 }
  0x75   : > { %p3014_p6 = pnand %p3012_p1, %p3461_p2  ;;  %p3020_p13 = scmp.lt.s32.totalorder %s3018_s20, %s3011_s16 }
  0x77   : > { %p3015_p8 = pneg %p3014_p6  ;;  %p3021_p3 = por %p3020_p13, %p3019_p11 }
  0x79   : > { %p3022_p5 = pnand %p3021_p3, %p3015_p8 }
  0x7b   : > { %3025 = shalt.err (!%p3022_p5)
}
  0x7c   : > { %s4244_s15 = smov 8   ;;  %s4245_s29 = smov 128  }
  0x7d   : > { %2607 = dma.hbm_to_vmem [thread:$0]  (!%p3439_p0), %s3448_s10, 2048, %s3451_s13, %s3455_s6, %s4245_s29, %s4245_s29, %s4244_s15  }
  0x7e   : > { %s3026_s27 = scalar_lea.hbm %s4184_s4, 2048  ;;  %p4246_p8 = scmp.ne.s32.totalorder %s4234_s22, 0 }
  0x7f   : > { %p3027_p4 = scmp.ne.s32.totalorder %s4184_s4, %s3026_s27  ;;  %p3033_p9 = scmp.lt.u32.totalorder %s3026_s27, %s4184_s4 }
  0x81   : > { %p3029_p11 = pnand %p3027_p4, %p4246_p8 }
  0x83   : > { %p3030_p13 = pneg %p3029_p11 }
  0x85   : > { %p3035_p10 = pnand %p3033_p9, %p3030_p13 }
  0x87   : > { %3038 = shalt.err (!%p3035_p10)
}
  0x88   : > { %s3039_s9 = scalar_lea.vmem %s335_s3, 2048  ;;  %p3047_p6 = scmp.lt.s32.totalorder %s335_s3, %s335_s3 }
  0x89   : > { %p3040_p7 = scmp.ne.s32.totalorder %s335_s3, %s3039_s9  ;;  %p3048_p3 = scmp.lt.s32.totalorder %s3039_s9, %s3039_s9 }
  0x8b   : > { %p3042_p12 = pnand %p3040_p7, %p4246_p8  ;;  %p3049_p5 = por %p3048_p3, %p3047_p6 }
  0x8d   : > { %p3043_p1 = pneg %p3042_p12 }
  0x8f   : > { %p3050_p0 = pnand %p3049_p5, %p3043_p1 }
  0x91   : > { %3053 = shalt.err (!%p3050_p0)
}
  0x92   : > { %p4247_p4 = scmp.ne.s32.totalorder %s4232_s28, 0  ;;  %s3230_s10 = smov [#allocation13]  }
  0x93   : > { %s366_s12 = sshll.u32 %s3230_s10, 4  ;;  %s3054_s9 = scalar_lea.hbm %s4188_s8, 1024  ;;  %s367_s12 = int_to_ptr.vmem [resolvable:$true] %s366_s12 }
  0x94   : > { %2594 = dma.hbm_to_vmem [thread:$0]  (!%p4247_p4), %s4184_s4, 2048, %s335_s3, [#allocation9], %s4245_s29, %s4245_s29, %s4244_s15  }
  0x95   : > { %p3055_p0 = scmp.ne.s32.totalorder %s4188_s8, %s3054_s9  ;;  %p3061_p9 = scmp.lt.u32.totalorder %s3054_s9, %s4188_s8 }
  0x97   : > { %p3057_p11 = pnand %p3055_p0, %p4246_p8 }
  0x99   : > { %p3058_p13 = pneg %p3057_p11 }
  0x9b   : > { %p3063_p10 = pnand %p3061_p9, %p3058_p13 }
  0x9d   : > { %3066 = shalt.err (!%p3063_p10)
}
  0x9e   : > { %s3067_s3 = scalar_lea.vmem %s367_s12, 1024  ;;  %p3075_p6 = scmp.lt.s32.totalorder %s367_s12, %s367_s12 }
  0x9f   : > { %p3068_p7 = scmp.ne.s32.totalorder %s367_s12, %s3067_s3  ;;  %p3076_p3 = scmp.lt.s32.totalorder %s3067_s3, %s3067_s3 }
  0xa1   : > { %p3070_p12 = pnand %p3068_p7, %p4246_p8  ;;  %p3077_p5 = por %p3076_p3, %p3075_p6 }
  0xa3   : > { %p3071_p1 = pneg %p3070_p12 }
  0xa5   : > { %p3078_p2 = pnand %p3077_p5, %p3071_p1 }
  0xa7   : > { %3081 = shalt.err (!%p3078_p2)
}
  0xa8   : > { %s4248_s1 = smov 4   ;;  %s4249_s13 = smov 64  }
  0xa9   : > { %2600 = dma.hbm_to_vmem [thread:$0]  (!%p4247_p4), %s4188_s8, 1024, %s367_s12, [#allocation12], %s4249_s13, %s4249_s13, %s4248_s1  }
  0xaa   : > { %s3535_s26 = scalar_lea.hbm %s4180_s0, %s3437_s11  ;;  %s390_s28 = scalar_lea.vmem [#allocation2], %s3434_s30 }
  0xab   : > { %s397_s9 = sshll.u32 %s390_s28, 4  ;;  %s4250_s27 = sand.u32 1, %s3216_s19   ;;  %s3538_s9 = int_to_ptr.vmem [resolvable:$true] %s397_s9 }
  0xac   : > { %s3542_s16 = scalar_lea.sflag [#allocation3], %s4250_s27  ;;  %s3082_s20 = scalar_lea.hbm %s3535_s26, 2048 }
  0xad   : > { %p3083_p2 = scmp.ne.s32.totalorder %s3535_s26, %s3082_s20  ;;  %p4251_p8 = scmp.ne.s32.totalorder %s4243_s17, 0 }
  0xae   : > { %s3087_s1 = scalar_lea.hbm %s4180_s0, 4096  ;;  %p3088_p11 = scmp.lt.u32.totalorder %s3535_s26, %s4180_s0 }
  0xaf   : > { %p3085_p4 = pnand %p3083_p2, %p4251_p8  ;;  %p3089_p13 = scmp.lt.u32.totalorder %s3087_s1, %s3082_s20 }
  0xb0   : > { %p3091_p10 = scmp.lt.u32.totalorder %s3082_s20, %s3535_s26 }
  0xb1   : > { %p3086_p0 = pneg %p3085_p4  ;;  %p3090_p9 = por %p3089_p13, %p3088_p11 }
  0xb3   : > { %p3092_p7 = por %p3091_p10, %p3090_p9 }
  0xb5   : > { %p3093_p12 = pnand %p3092_p7, %p3086_p0 }
  0xb7   : > { %3096 = shalt.err (!%p3093_p12)
}
  0xb8   : > { %s3097_s10 = scalar_lea.vmem %s3538_s9, 2048  ;;  %s3231_s22 = smov [#allocation2]  }
  0xb9   : > { %p3098_p1 = scmp.ne.s32.totalorder %s3538_s9, %s3097_s10  ;;  %s3102_s14 = sshll.u32 %s3231_s22, 4  ;;  %s3103_s14 = int_to_ptr.vmem [resolvable:$false] %s3102_s14 }
  0xba   : > { %s3104_s28 = scalar_lea.vmem %s3103_s14, 4096  ;;  %p3105_p5 = scmp.lt.s32.totalorder %s3538_s9, %s3103_s14 }
  0xbb   : > { %p3100_p6 = pnand %p3098_p1, %p4251_p8  ;;  %p3106_p2 = scmp.lt.s32.totalorder %s3104_s28, %s3097_s10 }
  0xbd   : > { %p3101_p3 = pneg %p3100_p6  ;;  %p3107_p4 = por %p3106_p2, %p3105_p5 }
  0xbf   : > { %p3108_p11 = pnand %p3107_p4, %p3101_p3 }
  0xc1   : > { %3111 = shalt.err (!%p3108_p11)
}
  0xc2   : > { %p4252_p0 = scmp.ne.s32.totalorder %s4241_s24, 0  ;;  %s3573_s12 = scalar_lea.hbm %s4182_s2, %s3437_s11 }
  0xc3   : > { %s432_s3 = scalar_lea.vmem [#allocation7], %s3434_s30  ;;  %s3112_s13 = scalar_lea.hbm %s3573_s12, 2048 }
  0xc4   : > { %2604 = dma.hbm_to_vmem [thread:$0]  (!%p4252_p0), %s3535_s26, 2048, %s3538_s9, %s3542_s16, %s4245_s29, %s4245_s29, %s4244_s15  }
  0xc5   : > { %s439_s1 = sshll.u32 %s432_s3, 4  ;;  %p3113_p13 = scmp.ne.s32.totalorder %s3573_s12, %s3112_s13  ;;  %s3576_s1 = int_to_ptr.vmem [resolvable:$true] %s439_s1 }
  0xc6   : > { %s3117_s9 = scalar_lea.hbm %s4182_s2, 4096  ;;  %p3118_p7 = scmp.lt.u32.totalorder %s3573_s12, %s4182_s2 }
  0xc7   : > { %p3115_p9 = pnand %p3113_p13, %p4251_p8  ;;  %p3119_p12 = scmp.lt.u32.totalorder %s3117_s9, %s3112_s13 }
  0xc8   : > { %p3121_p6 = scmp.lt.u32.totalorder %s3112_s13, %s3573_s12 }
  0xc9   : > { %p3116_p10 = pneg %p3115_p9  ;;  %p3120_p1 = por %p3119_p12, %p3118_p7 }
  0xcb   : > { %p3122_p3 = por %p3121_p6, %p3120_p1 }
  0xcd   : > { %p3123_p5 = pnand %p3122_p3, %p3116_p10 }
  0xcf   : > { %3126 = shalt.err (!%p3123_p5)
}
  0xd0   : > { %s3127_s30 = scalar_lea.vmem %s3576_s1, 2048  ;;  %s3232_s10 = smov [#allocation7]  }
  0xd1   : > { %p3128_p2 = scmp.ne.s32.totalorder %s3576_s1, %s3127_s30  ;;  %s3132_s22 = sshll.u32 %s3232_s10, 4  ;;  %s3133_s22 = int_to_ptr.vmem [resolvable:$false] %s3132_s22 }
  0xd2   : > { %s3134_s14 = scalar_lea.vmem %s3133_s22, 4096  ;;  %p3135_p13 = scmp.lt.s32.totalorder %s3576_s1, %s3133_s22 }
  0xd3   : > { %p3130_p4 = pnand %p3128_p2, %p4251_p8  ;;  %p3136_p9 = scmp.lt.s32.totalorder %s3134_s14, %s3127_s30 }
  0xd5   : > { %p3131_p11 = pneg %p3130_p4  ;;  %p3137_p7 = por %p3136_p9, %p3135_p13 }
  0xd7   : > { %p3138_p12 = pnand %p3137_p7, %p3131_p11 }
  0xd9   : > { %3141 = shalt.err (!%p3138_p12)
}
  0xda   : > { %2610 = dma.hbm_to_vmem [thread:$0]  (!%p4252_p0), %s3573_s12, 2048, %s3576_s1, %s3455_s6, %s4245_s29, %s4245_s29, %s4244_s15  }
  0xdb   : > { %p4253_p8 = scmp.ne.s32.totalorder %s4231_s25, 0 }
  0xdc   : > { %s3606_s17 = sand.u32 (!%p4253_p8), 1, %s3212_s18   ;;  %p4254_p10 = scmp.ne.s32.totalorder (!%p4253_p8), %s4228_s23, 0 }
  0xdd   : > { %451 = sbr.rel (%p4253_p8) target bundleno = 1336 (0x538), region = 64  ;;  %s3609_s28 = sshll.u32 (!%p4253_p8), %s3606_s17, 7 }
  0xde   : > { %s454_s24 = scalar_lea.sflag (!%p4253_p8), [#allocation3], %s3606_s17  ;;  %s3613_s27 = scalar_lea.vmem (!%p4253_p8), [#allocation2], %s3609_s28 }
  0xe4   : > { %3187 = dma.done.wait (%p4254_p10), %s454_s24, 2048  }
  0xe5   : > { %3189 = vsyncadd (%p4254_p10), %s454_s24, 4294965248  ;;  %s462_s6 = sand.u32 1, %s3318_s21   ;;  %s3621_s15 = scalar_lea.vmem [#allocation5], %s3609_s28 }
  0xe6   : > { %s463_s25 = scalar_lea.sflag [#allocation6], %s462_s6 }
  0xe7   : > { %3191 = dma.done.wait (%p4254_p10), %s463_s25, 4096  }
  0xe8   : > { %3193 = vsyncadd (%p4254_p10), %s463_s25, 4294963200  ;;  %s3628_s29 = scalar_lea.vmem [#allocation7], %s3609_s28  ;;  %p4255_p0 = scmp.eq.s32.totalorder %s3318_s21, 0 }
  0xea   : > { %3195 = dma.done.wait (%p4255_p0), [#allocation9], 6144   ;;  %p4256_p1 = pmov %p4255_p0 }
  0xeb   : > { %p4257_p6 = pmov %p4255_p0 }
  0xec   : > { %3197 = vsyncadd (%p4256_p1), [#allocation9], 4294961152 }
  0xed   : > { %3199 = dma.done.wait (%p4257_p6), [#allocation12], 3072   ;;  %p4258_p3 = pmov %p4255_p0 }
  0xee   : > { %v3233_v0 = vmov 0   ;;  %v2668_v1 = vld [vmem:[#allocation10 + $0x4] ss:$8 sps:$4 sm:$0xff]   ;;  %v2670_v2 = vld [vmem:[#allocation10] ss:$8 sps:$4 sm:$0xff]   ;;  %v547_v24 = vld [vmem:[%s3628_s29 + $0x10] sm:$0xff] }
  0xef   : > { %3201 = vsyncadd (%p4258_p3), [#allocation12], 4294964224  ;;  %777 = vmatprep.mubr.bf16.mxu0 %v3233_v0  ;;  %745 = vmatprep.subr.bf16.mxu0 %v2668_v1  ;;  %v2671_v3 = vld [vmem:[#allocation10 + $0x14] ss:$8 sps:$4 sm:$0xff]   ;;  %v2673_v4 = vld [vmem:[#allocation10 + $0x10] ss:$8 sps:$4 sm:$0xff]  }
  0xf0   : > { %746 = vmatpush1.bf16.msra.mxu0 %v2670_v2  ;;  %v2674_v5 = vld [vmem:[#allocation10 + $0x24] ss:$8 sps:$4 sm:$0xff]   ;;  %v2676_v6 = vld [vmem:[#allocation10 + $0x20] ss:$8 sps:$4 sm:$0xff]   ;;  %v2677_v7 = vld [vmem:[#allocation10 + $0x34] ss:$8 sps:$4 sm:$0xff]  }
  0xf1   : > { %747 = vmatprep.subr.bf16.mxu0 %v2671_v3  ;;  %v2679_v8 = vld [vmem:[#allocation10 + $0x30] ss:$8 sps:$4 sm:$0xff]   ;;  %v2680_v9 = vld [vmem:[#allocation10 + $0x44] ss:$8 sps:$4 sm:$0xff]   ;;  %v2682_v10 = vld [vmem:[#allocation10 + $0x40] ss:$8 sps:$4 sm:$0xff]  }
  0xf2   : > { %v2683_v11 = vld [vmem:[#allocation10 + $0x54] ss:$8 sps:$4 sm:$0xff]   ;;  %v2685_v12 = vld [vmem:[#allocation10 + $0x50] ss:$8 sps:$4 sm:$0xff]   ;;  %v2686_v13 = vld [vmem:[#allocation10 + $0x64] ss:$8 sps:$4 sm:$0xff]  }
  0xf3   : > { %v2688_v14 = vld [vmem:[#allocation10 + $0x60] ss:$8 sps:$4 sm:$0xff]   ;;  %v2689_v15 = vld [vmem:[#allocation10 + $0x74] ss:$8 sps:$4 sm:$0xff]   ;;  %v2691_v16 = vld [vmem:[#allocation10 + $0x70] ss:$8 sps:$4 sm:$0xff]  }
  0xf4   : > { %748 = vmatpush1.bf16.msra.mxu0 %v2673_v4  ;;  %v545_v17 = vld [vmem:[%s3628_s29] sm:$0xff]  ;;  %v546_v18 = vld [vmem:[%s3628_s29 + $0x8] sm:$0xff]  ;;  %v2697_v22 = vld [vmem:[#allocation8 + $0x14] ss:$8 sps:$4 sm:$0xff]   ;;  %s4259_s1 = sld [smem:[#allocation29_spill]]  ;;  %s4260_s26 = sld [smem:[#allocation30_spill]] }
  0xf5   : > { %749 = vmatprep.subr.bf16.mxu0 %v2674_v5  ;;  %v2694_v19 = vld [vmem:[#allocation8 + $0x4] ss:$8 sps:$4 sm:$0xff]   ;;  %v641_v20 = vpack.c.bf16 %v546_v18, %v545_v17  ;;  %v2692_v21 = vld [vmem:[#allocation8] ss:$8 sps:$4 sm:$0xff]   ;;  %v2695_v23 = vld [vmem:[#allocation8 + $0x10] ss:$8 sps:$4 sm:$0xff]  }
  0xf6   : > { %v548_v25 = vld [vmem:[%s3628_s29 + $0x18] sm:$0xff]  ;;  %v2700_v26 = vld [vmem:[#allocation8 + $0x24] ss:$8 sps:$4 sm:$0xff]   ;;  %v2698_v28 = vld [vmem:[#allocation8 + $0x20] ss:$8 sps:$4 sm:$0xff]   ;;  %s4261_s11 = sld [smem:[#allocation31_spill]] }
  0xf7   : > { %v642_v27 = vpack.c.bf16 %v548_v25, %v547_v24  ;;  %v2703_v29 = vld [vmem:[#allocation8 + $0x34] ss:$8 sps:$4 sm:$0xff]   ;;  %v2701_v30 = vld [vmem:[#allocation8 + $0x30] ss:$8 sps:$4 sm:$0xff]   ;;  %v549_v31 = vld [vmem:[%s3628_s29 + $0x20] sm:$0xff]  ;;  %s4061_s30 = scalar_lea.vmem [#allocation14], %s3609_s28 }
  0xf8   : > { %750 = vmatpush1.bf16.msra.mxu0 %v2676_v6  ;;  %v550_v32 = vld [vmem:[%s3628_s29 + $0x28] sm:$0xff]  ;;  %v2709_v36 = vld [vmem:[#allocation8 + $0x54] ss:$8 sps:$4 sm:$0xff]   ;;  %v2707_v37 = vld [vmem:[#allocation8 + $0x50] ss:$8 sps:$4 sm:$0xff]   ;;  %s2371_s10 = sshll.u32 %s3318_s21, 11 }
  0xf9   : > { %751 = vmatprep.subr.bf16.mxu0 %v2677_v7  ;;  %v2706_v33 = vld [vmem:[#allocation8 + $0x44] ss:$8 sps:$4 sm:$0xff]   ;;  %v643_v34 = vpack.c.bf16 %v550_v32, %v549_v31  ;;  %v2704_v35 = vld [vmem:[#allocation8 + $0x40] ss:$8 sps:$4 sm:$0xff]   ;;  %v551_v38 = vld [vmem:[%s3628_s29 + $0x30] sm:$0xff]  ;;  %s2077_s22 = sshll.u32 %s4061_s30, 4  ;;  %s4132_s22 = int_to_ptr.vmem [resolvable:$true] %s2077_s22 }
  0xfa   : > { %v552_v39 = vld [vmem:[%s3628_s29 + $0x38] sm:$0xff]  ;;  %v2712_v40 = vld [vmem:[#allocation8 + $0x64] ss:$8 sps:$4 sm:$0xff]   ;;  %v2710_v41 = vld [vmem:[#allocation8 + $0x60] ss:$8 sps:$4 sm:$0xff]   ;;  %s4262_s14 = sld [smem:[#allocation25_spill]] }
  0xfb   : > { %v644_v42 = vpack.c.bf16 %v552_v39, %v551_v38  ;;  %v2715_v43 = vld [vmem:[#allocation8 + $0x74] ss:$8 sps:$4 sm:$0xff]   ;;  %v2713_v44 = vld [vmem:[#allocation8 + $0x70] ss:$8 sps:$4 sm:$0xff]   ;;  %v553_v45 = vld [vmem:[%s3628_s29 + $0x40] sm:$0xff]  ;;  %s2064_s6 = scalar_lea.sflag [#allocation4], %s3606_s17 }
  0xfc   : > { %752 = vmatpush1.bf16.msra.mxu0 %v2679_v8  ;;  %v554_v46 = vld [vmem:[%s3628_s29 + $0x48] sm:$0xff]  ;;  %v2721_v50 = vld [vmem:[#allocation8 + $0x94] ss:$8 sps:$4 sm:$0xff]   ;;  %v2719_v51 = vld [vmem:[#allocation8 + $0x90] ss:$8 sps:$4 sm:$0xff]   ;;  %s3142_s25 = scalar_lea.vmem %s4132_s22, 2048 }
  0xfd   : > { %753 = vmatprep.subr.bf16.mxu0 %v2680_v9  ;;  %v2718_v47 = vld [vmem:[#allocation8 + $0x84] ss:$8 sps:$4 sm:$0xff]   ;;  %v2716_v48 = vld [vmem:[#allocation8 + $0x80] ss:$8 sps:$4 sm:$0xff]   ;;  %v645_v49 = vpack.c.bf16 %v554_v46, %v553_v45  ;;  %v555_v52 = vld [vmem:[%s3628_s29 + $0x50] sm:$0xff]  ;;  %p3143_p5 = scmp.ne.s32.totalorder %s4132_s22, %s3142_s25 }
  0xfe   : > { %v556_v53 = vld [vmem:[%s3628_s29 + $0x58] sm:$0xff]  ;;  %v2724_v54 = vld [vmem:[#allocation8 + $0xa4] ss:$8 sps:$4 sm:$0xff]   ;;  %v2722_v56 = vld [vmem:[#allocation8 + $0xa0] ss:$8 sps:$4 sm:$0xff]  }
  0xff   : > { %v646_v55 = vpack.c.bf16 %v556_v53, %v555_v52  ;;  %v2727_v57 = vld [vmem:[#allocation8 + $0xb4] ss:$8 sps:$4 sm:$0xff]   ;;  %v2725_v58 = vld [vmem:[#allocation8 + $0xb0] ss:$8 sps:$4 sm:$0xff]   ;;  %v557_v59 = vld [vmem:[%s3628_s29 + $0x60] sm:$0xff] }
 0x100   : > { %754 = vmatpush1.bf16.msra.mxu0 %v2682_v10  ;;  %v558_v60 = vld [vmem:[%s3628_s29 + $0x68] sm:$0xff]  ;;  %v2733_v1 = vld [vmem:[#allocation8 + $0xd4] ss:$8 sps:$4 sm:$0xff]   ;;  %v2731_v2 = vld [vmem:[#allocation8 + $0xd0] ss:$8 sps:$4 sm:$0xff]   ;;  %p4264_p2 = scmp.ne.s32.totalorder %s4262_s14, 0 }
 0x101   : > { %755 = vmatprep.subr.bf16.mxu0 %v2683_v11  ;;  %v2730_v61 = vld [vmem:[#allocation8 + $0xc4] ss:$8 sps:$4 sm:$0xff]   ;;  %v647_v62 = vpack.c.bf16 %v558_v60, %v557_v59  ;;  %v2728_v63 = vld [vmem:[#allocation8 + $0xc0] ss:$8 sps:$4 sm:$0xff]   ;;  %v559_v3 = vld [vmem:[%s3628_s29 + $0x70] sm:$0xff] }
 0x102   : > { %v560_v4 = vld [vmem:[%s3628_s29 + $0x78] sm:$0xff]  ;;  %v2736_v5 = vld [vmem:[#allocation8 + $0xe4] ss:$8 sps:$4 sm:$0xff]   ;;  %v2734_v9 = vld [vmem:[#allocation8 + $0xe0] ss:$8 sps:$4 sm:$0xff]   ;;  %p3144_p4 = pnand %p3143_p5, %p4264_p2 }
 0x103   : > { %v585_v6 = vld [vmem:[%s3621_s15] sm:$0xff]  ;;  %v586_v7 = vld [vmem:[%s3621_s15 + $0x8] sm:$0xff]  ;;  %v648_v8 = vpack.c.bf16 %v560_v4, %v559_v3  ;;  %v2739_v11 = vld [vmem:[#allocation8 + $0xf4] ss:$8 sps:$4 sm:$0xff]  }
 0x104   : > { %756 = vmatpush1.bf16.msra.mxu0 %v2685_v12  ;;  %v601_v10 = vpack.c.bf16 %v586_v7, %v585_v6  ;;  %v561_v12 = vld [vmem:[%s3613_s27] sm:$0xff]  ;;  %v563_v18 = vld [vmem:[%s3613_s27 + $0x10] sm:$0xff]  ;;  %v566_v25 = vld [vmem:[%s3613_s27 + $0x28] sm:$0xff]  ;;  %p3145_p11 = pneg %p3144_p4 }
 0x105   : > { %757 = vmatprep.subr.bf16.mxu0 %v2686_v13  ;;  %v562_v13 = vld [vmem:[%s3613_s27 + $0x8] sm:$0xff]  ;;  %v565_v24 = vld [vmem:[%s3613_s27 + $0x20] sm:$0xff]  ;;  %v568_v31 = vld [vmem:[%s3613_s27 + $0x38] sm:$0xff] }
 0x106   : > { %v593_v32 = vld [vmem:[%s3621_s15 + $0x40] sm:$0xff]  ;;  %v595_v38 = vld [vmem:[%s3621_s15 + $0x50] sm:$0xff]  ;;  %v596_v39 = vld [vmem:[%s3621_s15 + $0x58] sm:$0xff] }
 0x107   : > { %v598_v45 = vld [vmem:[%s3621_s15 + $0x68] sm:$0xff]  ;;  %v2749_v3 = vld [vmem:[#allocation11 + $0x20] sm:$0xff]   ;;  %v2752_v6 = vld [vmem:[#allocation11 + $0x70] sm:$0xff]  }
 0x108   : > { %758 = vmatpush1.bf16.msra.mxu0 %v2688_v14  ;;  %v587_v14 = vld [vmem:[%s3621_s15 + $0x10] sm:$0xff]  ;;  %v2742_v59 = vld [vmem:[#allocation11 + $0x48] sm:$0xff]  }
 0x109   : > { %759 = vmatprep.subr.bf16.mxu0 %v2689_v15  ;;  %v588_v15 = vld [vmem:[%s3621_s15 + $0x18] sm:$0xff]  ;;  %v2743_v60 = vld [vmem:[#allocation11 + $0x8] sm:$0xff]   ;;  %v2753_v7 = vld [vmem:[#allocation11 + $0x30] sm:$0xff]  }
 0x10a   : > { %v602_v17 = vpack.c.bf16 %v588_v15, %v587_v14  ;;  %v2750_v4 = vld [vmem:[#allocation11 + $0x68] sm:$0xff]  }
 0x10c   : > { %760 = vmatpush1.bf16.msra.mxu0 %v2691_v16  ;;  %v577_v16 = vpack.c.bf16 %v562_v13, %v561_v12  ;;  %v1131_v13 = vld [vmem:[%s4185_s5] sm:$0x3] }
 0x10d   : > { %1018 = vmatprep.subr.bf16.mxu0 %v2694_v19  ;;  %v564_v19 = vld [vmem:[%s3613_s27 + $0x18] sm:$0xff] }
 0x10f   : > { %778 = vmatmul.mubr.bf16.vlgmr.msra.gmra.mrb[0].mxu0 %v641_v20  ;;  %v589_v20 = vld [vmem:[%s3621_s15 + $0x20] sm:$0xff] }
 0x110   : > { %1019 = vmatpush1.bf16.msra.mxu0 %v2692_v21  ;;  %787 = vmatprep.mubr.bf16.mxu0 %v3233_v0  ;;  %v590_v21 = vld [vmem:[%s3621_s15 + $0x28] sm:$0xff] }
 0x111   : > { %1020 = vmatprep.subr.bf16.mxu0 %v2697_v22  ;;  %v578_v22 = vpack.c.bf16 %v564_v19, %v563_v18 }
 0x114   : > { %1021 = vmatpush1.bf16.msra.mxu0 %v2695_v23  ;;  %v603_v23 = vpack.c.bf16 %v590_v21, %v589_v20 }
 0x115   : > { %1022 = vmatprep.subr.bf16.mxu0 %v2700_v26  ;;  %v591_v26 = vld [vmem:[%s3621_s15 + $0x30] sm:$0xff] }
 0x117   : > { %788 = vmatmul.mubr.bf16.gmra.mrb[4].mxu0 %v642_v27  ;;  %v592_v27 = vld [vmem:[%s3621_s15 + $0x38] sm:$0xff] }
 0x118   : > { %1023 = vmatpush1.bf16.msra.mxu0 %v2698_v28  ;;  %797 = vmatprep.mubr.bf16.mxu0 %v3233_v0  ;;  %v579_v28 = vpack.c.bf16 %v566_v25, %v565_v24 }
 0x119   : > { %1024 = vmatprep.subr.bf16.mxu0 %v2703_v29  ;;  %v604_v29 = vpack.c.bf16 %v592_v27, %v591_v26 }
 0x11c   : > { %1025 = vmatpush1.bf16.msra.mxu0 %v2701_v30  ;;  %v567_v30 = vld [vmem:[%s3613_s27 + $0x30] sm:$0xff] }
 0x11d   : > { %1026 = vmatprep.subr.bf16.mxu0 %v2706_v33  ;;  %v594_v33 = vld [vmem:[%s3621_s15 + $0x48] sm:$0xff] }
 0x11f   : > { %798 = vmatmul.mubr.bf16.gmra.mrb[8].mxu0 %v643_v34  ;;  %v580_v34 = vpack.c.bf16 %v568_v31, %v567_v30 }
 0x120   : > { %1027 = vmatpush1.bf16.msra.mxu0 %v2704_v35  ;;  %807 = vmatprep.mubr.bf16.mxu0 %v3233_v0  ;;  %v605_v35 = vpack.c.bf16 %v594_v33, %v593_v32 }
 0x121   : > { %1028 = vmatprep.subr.bf16.mxu0 %v2709_v36  ;;  %v569_v36 = vld [vmem:[%s3613_s27 + $0x40] sm:$0xff] }
 0x124   : > { %1029 = vmatpush1.bf16.msra.mxu0 %v2707_v37  ;;  %v570_v37 = vld [vmem:[%s3613_s27 + $0x48] sm:$0xff] }
 0x125   : > { %1030 = vmatprep.subr.bf16.mxu0 %v2712_v40  ;;  %v581_v40 = vpack.c.bf16 %v570_v37, %v569_v36 }
 0x127   : > { %808 = vmatmul.mubr.bf16.gmra.mrb[12].mxu0 %v644_v42  ;;  %v571_v42 = vld [vmem:[%s3613_s27 + $0x50] sm:$0xff] }
 0x128   : > { %1031 = vmatpush1.bf16.msra.mxu0 %v2710_v41  ;;  %817 = vmatprep.mubr.bf16.mxu0 %v3233_v0  ;;  %v606_v41 = vpack.c.bf16 %v596_v39, %v595_v38 }
 0x129   : > { %1032 = vmatprep.subr.bf16.mxu0 %v2715_v43  ;;  %v572_v43 = vld [vmem:[%s3613_s27 + $0x58] sm:$0xff] }
 0x12a   : > { %v582_v46 = vpack.c.bf16 %v572_v43, %v571_v42 }
 0x12c   : > { %1033 = vmatpush1.bf16.msra.mxu0 %v2713_v44  ;;  %v597_v44 = vld [vmem:[%s3621_s15 + $0x60] sm:$0xff] }
 0x12d   : > { %1034 = vmatprep.subr.bf16.mxu0 %v2718_v47  ;;  %v607_v47 = vpack.c.bf16 %v598_v45, %v597_v44 }
 0x12f   : > { %818 = vmatmul.mubr.bf16.gmra.mrb[16].mxu0 %v645_v49  ;;  %v574_v49 = vld [vmem:[%s3613_s27 + $0x68] sm:$0xff] }
 0x130   : > { %1035 = vmatpush1.bf16.msra.mxu0 %v2716_v48  ;;  %827 = vmatprep.mubr.bf16.mxu0 %v3233_v0  ;;  %v573_v48 = vld [vmem:[%s3613_s27 + $0x60] sm:$0xff] }
 0x131   : > { %1036 = vmatprep.subr.bf16.mxu0 %v2721_v50  ;;  %v599_v50 = vld [vmem:[%s3621_s15 + $0x70] sm:$0xff]  ;;  %v583_v52 = vpack.c.bf16 %v574_v49, %v573_v48 }
 0x134   : > { %1037 = vmatpush1.bf16.msra.mxu0 %v2719_v51  ;;  %v600_v51 = vld [vmem:[%s3621_s15 + $0x78] sm:$0xff]  ;;  %s3234_s15 = smov [#allocation14]  }
 0x135   : > { %1038 = vmatprep.subr.bf16.mxu0 %v2724_v54  ;;  %v608_v53 = vpack.c.bf16 %v600_v51, %v599_v50  ;;  %v575_v54 = vld [vmem:[%s3613_s27 + $0x70] sm:$0xff]  ;;  %s3146_s23 = sshll.u32 %s3234_s15, 4  ;;  %s3147_s23 = int_to_ptr.vmem [resolvable:$false] %s3146_s23 }
 0x136   : > { %s3148_s20 = scalar_lea.vmem %s3147_s23, 4096  ;;  %p3149_p13 = scmp.lt.s32.totalorder %s4132_s22, %s3147_s23 }
 0x137   : > { %828 = vmatmul.mubr.bf16.gmra.mrb[20].mxu0 %v646_v55  ;;  %v576_v55 = vld [vmem:[%s3613_s27 + $0x78] sm:$0xff]  ;;  %s4263_s27 = sld [smem:[#allocation32_spill]]  ;;  %p3150_p9 = scmp.lt.s32.totalorder %s3148_s20, %s3142_s25 }
 0x138   : > { %1039 = vmatpush1.bf16.msra.mxu0 %v2722_v56  ;;  %837 = vmatprep.mubr.bf16.mxu0 %v3233_v0  ;;  %v584_v56 = vpack.c.bf16 %v576_v55, %v575_v54 }
 0x139   : > { %1040 = vmatprep.subr.bf16.mxu0 %v2727_v57  ;;  %v2740_v57 = vld [vmem:[#allocation11 + $0x40] sm:$0xff]   ;;  %p3151_p7 = por %p3150_p9, %p3149_p13 }
 0x13a   : > { %2372 = vmatprep.subr.bf16.mxu1 %v2740_v57 }
 0x13b   : > { %p3152_p12 = pnand %p3151_p7, %p3145_p11 }
 0x13c   : > { %1041 = vmatpush1.bf16.msra.mxu0 %v2725_v58  ;;  %v2741_v58 = vld [vmem:[#allocation11] sm:$0xff]  }
 0x13d   : > { %1042 = vmatprep.subr.bf16.mxu0 %v2730_v61  ;;  %2373 = vmatpush3.bf16.msra.mxu1 %v2741_v58  ;;  %v2744_v61 = vld [vmem:[#allocation11 + $0x50] sm:$0xff]   ;;  %s4130_s21 = scalar_lea.hbm %s4263_s27, %s2371_s10 }
 0x13e   : > { %2374 = vmatprep.subr.bf16.mxu1 %v2742_v59 }
 0x13f   : > { %838 = vmatmul.mubr.bf16.gmra.mrb[24].mxu0 %v647_v62  ;;  %v2745_v62 = vld [vmem:[#allocation11 + $0x10] sm:$0xff]  }
 0x140   : > { %1043 = vmatpush1.bf16.msra.mxu0 %v2728_v63  ;;  %847 = vmatprep.mubr.bf16.mxu0 %v3233_v0  ;;  %v2737_v0 = vld [vmem:[#allocation8 + $0xf0] ss:$8 sps:$4 sm:$0xff]  }
 0x141   : > { %1044 = vmatprep.subr.bf16.mxu0 %v2733_v1  ;;  %2375 = vmatpush3.bf16.msra.mxu1 %v2743_v60  ;;  %v2746_v63 = vld [vmem:[#allocation11 + $0x58] sm:$0xff]  }
 0x142   : > { %2376 = vmatprep.subr.bf16.mxu1 %v2744_v61  ;;  %v2747_v1 = vld [vmem:[#allocation11 + $0x18] sm:$0xff]  }
 0x144   : > { %1045 = vmatpush1.bf16.msra.mxu0 %v2731_v2  ;;  %v2748_v2 = vld [vmem:[#allocation11 + $0x60] sm:$0xff]  }
 0x145   : > { %1046 = vmatprep.subr.bf16.mxu0 %v2736_v5  ;;  %2377 = vmatpush3.bf16.msra.mxu1 %v2745_v62  ;;  %v2751_v5 = vld [vmem:[#allocation11 + $0x28] sm:$0xff]  }
 0x146   : > { %2378 = vmatprep.subr.bf16.mxu1 %v2746_v63 }
 0x147   : > { %848 = vmatmul.mubr.bf16.gmra.mrb[28].mxu0 %v648_v8  ;;  %v2754_v8 = vld [vmem:[#allocation11 + $0x78] sm:$0xff]  }
 0x148   : > { %1047 = vmatpush1.bf16.msra.mxu0 %v2734_v9  ;;  %1050 = vmatprep.mubr.bf16.mxu0 %v601_v10  ;;  %v2755_v9 = vld [vmem:[#allocation11 + $0x38] sm:$0xff]   ;;  %v3694_v10 = vld [vmem:[#allocation13] sm:$0xff]  }
 0x149   : > { %1048 = vmatprep.subr.bf16.mxu0 %v2739_v11  ;;  %2379 = vmatpush3.bf16.msra.mxu1 %v2747_v1  ;;  %v1133_v11 = vlaneseq }
 0x14a   : > { %2380 = vmatprep.subr.bf16.mxu1 %v2748_v2 }
 0x14c   : > { %1049 = vmatpush1.bf16.msra.mxu0 %v2737_v0  ;;  %v1134_v0 = vshrl.u32 %v1133_v11, 7 }
 0x14d   : > { %2381 = vmatpush3.bf16.msra.mxu1 %v2749_v3 }
 0x14e   : > { %2382 = vmatprep.subr.bf16.mxu1 %v2750_v4  ;;  %v1135_v12 = vsub.s32 0, %v1134_v0  ;;  %v1139_v14 = vsub.s32 1, %v1134_v0 }
 0x14f   : > { %1051 = vmatmul.mubr.bf16.vlgmr.msra.gmra.mrb[0].mxu0 %v577_v16 }
 0x150   : > { %1060 = vmatprep.mubr.bf16.mxu0 %v602_v17  ;;  %v3700_v15 = vrot.slane %v1131_v13, %v1135_v12  ;;  %v3702_v16 = vrot.slane %v1131_v13, %v1139_v14 }
 0x151   : > { %2383 = vmatpush3.bf16.msra.mxu1 %v2751_v5 }
 0x152   : > { %2384 = vmatprep.subr.bf16.mxu1 %v2752_v6 }
 0x155   : > { %2385 = vmatpush3.bf16.msra.mxu1 %v2753_v7 }
 0x156   : > { %2386 = vmatprep.subr.bf16.mxu1 %v2754_v8 }
 0x157   : > { %1061 = vmatmul.mubr.bf16.gmra.mrb[4].mxu0 %v578_v22 }
 0x158   : > { %1070 = vmatprep.mubr.bf16.mxu0 %v603_v23 }
 0x159   : > { %2387 = vmatpush3.bf16.msra.mxu1 %v2755_v9 }
 0x15a   : > { %2468 = vmatprep.subr.bf16.mxu1 %v3694_v10 }
 0x15f   : > { %1071 = vmatmul.mubr.bf16.gmra.mrb[8].mxu0 %v579_v28 }
 0x160   : > { %1080 = vmatprep.mubr.bf16.mxu0 %v604_v29 }
 0x167   : > { %1081 = vmatmul.mubr.bf16.gmra.mrb[12].mxu0 %v580_v34 }
 0x168   : > { %1090 = vmatprep.mubr.bf16.mxu0 %v605_v35 }
 0x16f   : > { %1091 = vmatmul.mubr.bf16.gmra.mrb[16].mxu0 %v581_v40 }
 0x170   : > { %1100 = vmatprep.mubr.bf16.mxu0 %v606_v41 }
 0x177   : > { %1101 = vmatmul.mubr.bf16.gmra.mrb[20].mxu0 %v582_v46 }
 0x178   : > { %1110 = vmatprep.mubr.bf16.mxu0 %v607_v47 }
 0x17f   : > { %1111 = vmatmul.mubr.bf16.gmra.mrb[24].mxu0 %v583_v52 }
 0x180   : > { %1120 = vmatprep.mubr.bf16.mxu0 %v608_v53 }
 0x187   : > { %1121 = vmatmul.mubr.bf16.gmra.mrb[28].mxu0 %v584_v56 }
 0x222   : > { %v1052_v17 = vpop.f32.mrb[0].mxu0 }
 0x223   : > { %v3705_v18 = vadd.f32 %v3700_v15, %v1052_v17  ;;  %v1054_v19 = vpop.f32.mrb[1].mxu0 }
 0x224   : > { %v3708_v20 = vadd.f32 %v3702_v16, %v1054_v19  ;;  %v1056_v21 = vpop.f32.mrb[2].mxu0 }
 0x225   : > { %v2304_v22 = vmul.f32 -1.442695, %v3705_v18  ;;  %v3712_v23 = vadd.f32 %v3700_v15, %v1056_v21  ;;  %v1058_v24 = vpop.f32.mrb[3].mxu0 }
 0x226   : > { %v2305_v25 = vmul.f32 -1.442695, %v3708_v20  ;;  %v3716_v26 = vadd.f32 %v3702_v16, %v1058_v24 }
 0x227   : > { %2764 = vpow2.f32 %v2304_v22  ;;  %v2306_v27 = vmul.f32 -1.442695, %v3712_v23 }
 0x228   : > { %2766 = vpow2.f32 %v2305_v25  ;;  %v2307_v28 = vmul.f32 -1.442695, %v3716_v26 }
 0x229   : > { %2768 = vpow2.f32 %v2306_v27 }
 0x22a   : > { %2770 = vpow2.f32 %v2307_v28  ;;  %v1062_v29 = vpop.f32.mrb[4].mxu0 }
 0x22b   : > { %v3721_v30 = vadd.f32 %v3700_v15, %v1062_v29  ;;  %v1064_v31 = vpop.f32.mrb[5].mxu0 }
 0x22c   : > { %v3724_v32 = vadd.f32 %v3702_v16, %v1064_v31  ;;  %v1066_v33 = vpop.f32.mrb[6].mxu0 }
 0x22d   : > { %v2308_v34 = vmul.f32 -1.442695, %v3721_v30  ;;  %v3728_v35 = vadd.f32 %v3700_v15, %v1066_v33  ;;  %v1068_v36 = vpop.f32.mrb[7].mxu0 }
 0x22e   : > { %v2309_v37 = vmul.f32 -1.442695, %v3724_v32  ;;  %v3732_v38 = vadd.f32 %v3702_v16, %v1068_v36 }
 0x22f   : > { %2772 = vpow2.f32 %v2308_v34  ;;  %v2310_v39 = vmul.f32 -1.442695, %v3728_v35 }
 0x230   : > { %2774 = vpow2.f32 %v2309_v37  ;;  %v2311_v40 = vmul.f32 -1.442695, %v3732_v38 }
 0x231   : > { %v2765_v41 = vpop.eup %2764  ;;  %2776 = vpow2.f32 %v2310_v39 }
 0x232   : > { %v2767_v42 = vpop.eup %2766  ;;  %v1271_v43 = vadd.f32 1.0, %v2765_v41  ;;  %2778 = vpow2.f32 %v2311_v40  ;;  %v1072_v44 = vpop.f32.mrb[8].mxu0 }
 0x233   : > { %v2769_v45 = vpop.eup %2768  ;;  %v1272_v46 = vadd.f32 1.0, %v2767_v42  ;;  %v3737_v47 = vadd.f32 %v3700_v15, %v1072_v44  ;;  %v1074_v48 = vpop.f32.mrb[9].mxu0 }
 0x234   : > { %v2771_v49 = vpop.eup %2770  ;;  %2780 = vrcp.f32 %v1271_v43  ;;  %v1273_v50 = vadd.f32 1.0, %v2769_v45  ;;  %v3740_v51 = vadd.f32 %v3702_v16, %v1074_v48  ;;  %v1076_v52 = vpop.f32.mrb[10].mxu0 }
 0x235   : > { %2782 = vrcp.f32 %v1272_v46  ;;  %v1274_v53 = vadd.f32 1.0, %v2771_v49  ;;  %v2312_v54 = vmul.f32 -1.442695, %v3737_v47  ;;  %v3744_v55 = vadd.f32 %v3700_v15, %v1076_v52  ;;  %v1078_v56 = vpop.f32.mrb[11].mxu0 }
 0x236   : > { %2784 = vrcp.f32 %v1273_v50  ;;  %v2313_v57 = vmul.f32 -1.442695, %v3740_v51  ;;  %v3748_v58 = vadd.f32 %v3702_v16, %v1078_v56  ;;  %v3782_v50 = vld [vmem:[#allocation13 + $0x8] sm:$0xff]  }
 0x237   : > { %2786 = vrcp.f32 %v1274_v53  ;;  %v2314_v59 = vmul.f32 -1.442695, %v3744_v55 }
 0x238   : > { %2788 = vpow2.f32 %v2312_v54  ;;  %v2315_v60 = vmul.f32 -1.442695, %v3748_v58 }
 0x239   : > { %v2773_v61 = vpop.eup %2772  ;;  %2790 = vpow2.f32 %v2313_v57 }
 0x23a   : > { %v2775_v62 = vpop.eup %2774  ;;  %v1275_v63 = vadd.f32 1.0, %v2773_v61  ;;  %2792 = vpow2.f32 %v2314_v59  ;;  %v1082_v1 = vpop.f32.mrb[12].mxu0 }
 0x23b   : > { %v2777_v2 = vpop.eup %2776  ;;  %v1276_v3 = vadd.f32 1.0, %v2775_v62  ;;  %2794 = vpow2.f32 %v2315_v60  ;;  %v3753_v4 = vadd.f32 %v3700_v15, %v1082_v1  ;;  %v1084_v5 = vpop.f32.mrb[13].mxu0 }
 0x23c   : > { %v2779_v6 = vpop.eup %2778  ;;  %2796 = vrcp.f32 %v1275_v63  ;;  %v1277_v7 = vadd.f32 1.0, %v2777_v2  ;;  %v3756_v8 = vadd.f32 %v3702_v16, %v1084_v5  ;;  %v1086_v9 = vpop.f32.mrb[14].mxu0  ;;  %v3794_v2 = vld [vmem:[#allocation13 + $0x10] sm:$0xff]  }
 0x23d   : > { %2798 = vrcp.f32 %v1276_v3  ;;  %v1278_v11 = vadd.f32 1.0, %v2779_v6  ;;  %v2316_v0 = vmul.f32 -1.442695, %v3753_v4  ;;  %v3760_v12 = vadd.f32 %v3700_v15, %v1086_v9  ;;  %v1088_v13 = vpop.f32.mrb[15].mxu0 }
 0x23e   : > { %v2781_v14 = vpop.eup %2780  ;;  %2800 = vrcp.f32 %v1277_v7  ;;  %v2317_v17 = vmul.f32 -1.442695, %v3756_v8  ;;  %v3764_v19 = vadd.f32 %v3702_v16, %v1088_v13 }
 0x23f   : > { %v2783_v21 = vpop.eup %2782  ;;  %2802 = vrcp.f32 %v1278_v11  ;;  %v2318_v22 = vmul.f32 -1.442695, %v3760_v12  ;;  %v1367_v28 = vmul.f32 %v2781_v14, %v3705_v18 }
 0x240   : > { %v2785_v24 = vpop.eup %2784  ;;  %2804 = vpow2.f32 %v2316_v0  ;;  %v2319_v25 = vmul.f32 -1.442695, %v3764_v19  ;;  %v1368_v34 = vmul.f32 %v2783_v21, %v3708_v20 }
 0x241   : > { %v2787_v27 = vpop.eup %2786  ;;  %v1369_v29 = vmul.f32 %v2785_v24, %v3712_v23  ;;  %2806 = vpow2.f32 %v2317_v17 }
 0x242   : > { %v2789_v31 = vpop.eup %2788  ;;  %2808 = vpow2.f32 %v2318_v22  ;;  %v1092_v33 = vpop.f32.mrb[16].mxu0  ;;  %v1370_v36 = vmul.f32 %v2787_v27, %v3716_v26 }
 0x243   : > { %v2791_v37 = vpop.eup %2790  ;;  %v1279_v39 = vadd.f32 1.0, %v2789_v31  ;;  %2810 = vpow2.f32 %v2319_v25  ;;  %v3773_v40 = vadd.f32 %v3700_v15, %v1092_v33  ;;  %v1094_v41 = vpop.f32.mrb[17].mxu0  ;;  %v1399_v42 = vpack.c.bf16 %v1369_v29, %v1367_v28  ;;  %v3810_v28 = vld [vmem:[#allocation13 + $0x18] sm:$0xff]  }
 0x244   : > { %v2793_v43 = vpop.eup %2792  ;;  %v1280_v18 = vadd.f32 1.0, %v2791_v37  ;;  %v3776_v23 = vadd.f32 %v3702_v16, %v1094_v41  ;;  %v1096_v44 = vpop.f32.mrb[18].mxu0  ;;  %v1400_v45 = vpack.c.bf16 %v1370_v36, %v1368_v34 }
 0x245   : > { %v2795_v46 = vpop.eup %2794  ;;  %2812 = vrcp.f32 %v1279_v39  ;;  %v1281_v20 = vadd.f32 1.0, %v2793_v43  ;;  %v2320_v26 = vmul.f32 -1.442695, %v3773_v40  ;;  %v3780_v48 = vadd.f32 %v3700_v15, %v1096_v44  ;;  %v1098_v49 = vpop.f32.mrb[19].mxu0 }
 0x246   : > { %v2797_v52 = vpop.eup %2796  ;;  %2814 = vrcp.f32 %v1280_v18  ;;  %v1282_v53 = vadd.f32 1.0, %v2795_v46  ;;  %v2321_v54 = vmul.f32 -1.442695, %v3776_v23  ;;  %v3786_v56 = vadd.f32 %v3702_v16, %v1098_v49  ;;  %1582 = vmatprep.mubr.bf16.mxu1 %v1400_v45 }
 0x247   : > { %v2799_v57 = vpop.eup %2798  ;;  %2816 = vrcp.f32 %v1281_v20  ;;  %v2322_v59 = vmul.f32 -1.442695, %v3780_v48  ;;  %1583 = vmatmul.mubr.bf16.vlgmr.msra.gmra.mrb[0].mxu1 %v1399_v42  ;;  %v1371_v63 = vmul.f32 %v2797_v52, %v3721_v30 }
 0x248   : > { %v2801_v60 = vpop.eup %2800  ;;  %2818 = vrcp.f32 %v1282_v53  ;;  %v2323_v61 = vmul.f32 -1.442695, %v3786_v56  ;;  %2469 = vmatpush3.bf16.msra.mxu1 %v3694_v10  ;;  %v1372_v5 = vmul.f32 %v2799_v57, %v3724_v32 }
 0x249   : > { %v2803_v62 = vpop.eup %2802  ;;  %v1373_v1 = vmul.f32 %v2801_v60, %v3728_v35  ;;  %2820 = vpow2.f32 %v2320_v26  ;;  %2470 = vmatprep.subr.bf16.mxu1 %v3782_v50 }
 0x24a   : > { %v2805_v3 = vpop.eup %2804  ;;  %v1374_v6 = vmul.f32 %v2803_v62, %v3732_v38  ;;  %2822 = vpow2.f32 %v2321_v54  ;;  %v1102_v7 = vpop.f32.mrb[20].mxu0 }
 0x24b   : > { %v2807_v9 = vpop.eup %2806  ;;  %v1283_v11 = vadd.f32 1.0, %v2805_v3  ;;  %2824 = vpow2.f32 %v2322_v59  ;;  %v3799_v0 = vadd.f32 %v3700_v15, %v1102_v7  ;;  %v1104_v30 = vpop.f32.mrb[21].mxu0  ;;  %v1401_v35 = vpack.c.bf16 %v1373_v1, %v1371_v63 }
 0x24c   : > { %v2809_v13 = vpop.eup %2808  ;;  %v1284_v14 = vadd.f32 1.0, %v2807_v9  ;;  %2826 = vpow2.f32 %v2323_v61  ;;  %v3802_v17 = vadd.f32 %v3702_v16, %v1104_v30  ;;  %v1106_v21 = vpop.f32.mrb[22].mxu0  ;;  %v1402_v32 = vpack.c.bf16 %v1374_v6, %v1372_v5  ;;  %2471 = vmatpush3.bf16.msra.mxu1 %v3782_v50 }
 0x24d   : > { %v2811_v38 = vpop.eup %2810  ;;  %2828 = vrcp.f32 %v1283_v11  ;;  %v1285_v22 = vadd.f32 1.0, %v2809_v13  ;;  %v2324_v24 = vmul.f32 -1.442695, %v3799_v0  ;;  %v3807_v25 = vadd.f32 %v3700_v15, %v1106_v21  ;;  %v1108_v27 = vpop.f32.mrb[23].mxu0  ;;  %2472 = vmatprep.subr.bf16.mxu1 %v3794_v2 }
 0x24e   : > { %2830 = vrcp.f32 %v1284_v14  ;;  %v1286_v29 = vadd.f32 1.0, %v2811_v38  ;;  %v2325_v31 = vmul.f32 -1.442695, %v3802_v17  ;;  %v3814_v33 = vadd.f32 %v3702_v16, %v1108_v27  ;;  %1590 = vmatprep.mubr.bf16.mxu1 %v1402_v32 }
 0x24f   : > { %v2813_v34 = vpop.eup %2812  ;;  %2832 = vrcp.f32 %v1285_v22  ;;  %v2326_v36 = vmul.f32 -1.442695, %v3807_v25  ;;  %1591 = vmatmul.mubr.bf16.gmra.mrb[4].mxu1 %v1401_v35 }
 0x250   : > { %v2815_v37 = vpop.eup %2814  ;;  %2834 = vrcp.f32 %v1286_v29  ;;  %v2327_v39 = vmul.f32 -1.442695, %v3814_v33  ;;  %2473 = vmatpush3.bf16.msra.mxu1 %v3794_v2  ;;  %v1375_v43 = vmul.f32 %v2813_v34, %v3737_v47 }
 0x251   : > { %v2817_v41 = vpop.eup %2816  ;;  %2836 = vpow2.f32 %v2324_v24  ;;  %2474 = vmatprep.subr.bf16.mxu1 %v3810_v28  ;;  %v1376_v46 = vmul.f32 %v2815_v37, %v3740_v51 }
 0x252   : > { %v2819_v42 = vpop.eup %2818  ;;  %v1377_v18 = vmul.f32 %v2817_v41, %v3744_v55  ;;  %2838 = vpow2.f32 %v2325_v31  ;;  %v1112_v44 = vpop.f32.mrb[24].mxu0 }
 0x253   : > { %v2821_v45 = vpop.eup %2820  ;;  %v1378_v20 = vmul.f32 %v2819_v42, %v3748_v58  ;;  %2840 = vpow2.f32 %v2326_v36  ;;  %v3825_v26 = vadd.f32 %v3700_v15, %v1112_v44  ;;  %v1114_v49 = vpop.f32.mrb[25].mxu0 }
 0x254   : > { %v2823_v52 = vpop.eup %2822  ;;  %v1287_v53 = vadd.f32 1.0, %v2821_v45  ;;  %2842 = vpow2.f32 %v2327_v39  ;;  %v3828_v54 = vadd.f32 %v3702_v16, %v1114_v49  ;;  %v1116_v47 = vpop.f32.mrb[26].mxu0  ;;  %v1403_v55 = vpack.c.bf16 %v1377_v18, %v1375_v43  ;;  %2475 = vmatpush3.bf16.msra.mxu1 %v3810_v28 }
 0x255   : > { %v2825_v57 = vpop.eup %2824  ;;  %v1288_v59 = vadd.f32 1.0, %v2823_v52  ;;  %v3832_v51 = vadd.f32 %v3700_v15, %v1116_v47  ;;  %v1118_v58 = vpop.f32.mrb[27].mxu0  ;;  %v1404_v60 = vpack.c.bf16 %v1378_v20, %v1376_v46  ;;  %v2328_v63 = vmul.f32 -1.442695, %v3825_v26 }
 0x256   : > { %v2827_v61 = vpop.eup %2826  ;;  %2844 = vrcp.f32 %v1287_v53  ;;  %v1289_v62 = vadd.f32 1.0, %v2825_v57  ;;  %v3836_v1 = vadd.f32 %v3702_v16, %v1118_v58  ;;  %v2329_v6 = vmul.f32 -1.442695, %v3828_v54 }
 0x257   : > { %v2829_v3 = vpop.eup %2828  ;;  %2846 = vrcp.f32 %v1288_v59  ;;  %v1290_v5 = vadd.f32 1.0, %v2827_v61  ;;  %1598 = vmatprep.mubr.bf16.mxu1 %v1404_v60  ;;  %v2330_v9 = vmul.f32 -1.442695, %v3832_v51 }
 0x258   : > { %v2831_v7 = vpop.eup %2830  ;;  %2848 = vrcp.f32 %v1289_v62  ;;  %1599 = vmatmul.mubr.bf16.gmra.mrb[8].mxu1 %v1403_v55  ;;  %v2331_v30 = vmul.f32 -1.442695, %v3836_v1  ;;  %v1379_v13 = vmul.f32 %v2829_v3, %v3753_v4 }
 0x259   : > { %v2833_v11 = vpop.eup %2832  ;;  %2850 = vrcp.f32 %v1290_v5 }
 0x25a   : > { %v2835_v35 = vpop.eup %2834  ;;  %v1381_v14 = vmul.f32 %v2833_v11, %v3760_v12  ;;  %2852 = vpow2.f32 %v2328_v63  ;;  %v1122_v21 = vpop.f32.mrb[28].mxu0  ;;  %v1380_v12 = vmul.f32 %v2831_v7, %v3756_v8 }
 0x25b   : > { %v2837_v32 = vpop.eup %2836  ;;  %v1382_v38 = vmul.f32 %v2835_v35, %v3764_v19  ;;  %2854 = vpow2.f32 %v2329_v6  ;;  %v3845_v22 = vadd.f32 %v3700_v15, %v1122_v21  ;;  %v1124_v24 = vpop.f32.mrb[29].mxu0 }
 0x25c   : > { %v2839_v27 = vpop.eup %2838  ;;  %v1291_v29 = vadd.f32 1.0, %v2837_v32  ;;  %2856 = vpow2.f32 %v2330_v9  ;;  %v3848_v31 = vadd.f32 %v3702_v16, %v1124_v24  ;;  %v1126_v34 = vpop.f32.mrb[30].mxu0  ;;  %v1405_v4 = vpack.c.bf16 %v1381_v14, %v1379_v13 }
 0x25d   : > { %v2841_v36 = vpop.eup %2840  ;;  %v1292_v37 = vadd.f32 1.0, %v2839_v27  ;;  %2858 = vpow2.f32 %v2331_v30  ;;  %v3852_v19 = vadd.f32 %v3700_v15, %v1126_v34  ;;  %v1128_v39 = vpop.f32.mrb[31].mxu0  ;;  %v2332_v43 = vmul.f32 -1.442695, %v3845_v22 }
 0x25e   : > { %v2843_v41 = vpop.eup %2842  ;;  %2860 = vrcp.f32 %v1291_v29  ;;  %v1293_v42 = vadd.f32 1.0, %v2841_v36  ;;  %v3856_v18 = vadd.f32 %v3702_v16, %v1128_v39  ;;  %v2333_v45 = vmul.f32 -1.442695, %v3848_v31 }
 0x25f   : > { %2862 = vrcp.f32 %v1292_v37  ;;  %v1294_v44 = vadd.f32 1.0, %v2843_v41  ;;  %v1406_v46 = vpack.c.bf16 %v1382_v38, %v1380_v12  ;;  %v2334_v20 = vmul.f32 -1.442695, %v3852_v19 }
 0x260   : > { %v2845_v8 = vpop.eup %2844  ;;  %2864 = vrcp.f32 %v1293_v42  ;;  %v2335_v49 = vmul.f32 -1.442695, %v3856_v18 }
 0x261   : > { %v2847_v15 = vpop.eup %2846  ;;  %2866 = vrcp.f32 %v1294_v44  ;;  %1606 = vmatprep.mubr.bf16.mxu1 %v1406_v46  ;;  %v1383_v16 = vmul.f32 %v2845_v8, %v3773_v40 }
 0x262   : > { %v2849_v52 = vpop.eup %2848  ;;  %2868 = vpow2.f32 %v2332_v43  ;;  %1607 = vmatmul.mubr.bf16.gmra.mrb[12].mxu1 %v1405_v4  ;;  %v1384_v57 = vmul.f32 %v2847_v15, %v3776_v23 }
 0x263   : > { %v2851_v53 = vpop.eup %2850  ;;  %v1385_v47 = vmul.f32 %v2849_v52, %v3780_v48  ;;  %2870 = vpow2.f32 %v2333_v45 }
 0x264   : > { %v2853_v55 = vpop.eup %2852  ;;  %v1386_v59 = vmul.f32 %v2851_v53, %v3786_v56  ;;  %2872 = vpow2.f32 %v2334_v20 }
 0x265   : > { %v2855_v58 = vpop.eup %2854  ;;  %v1295_v60 = vadd.f32 1.0, %v2853_v55  ;;  %2874 = vpow2.f32 %v2335_v49  ;;  %v1407_v61 = vpack.c.bf16 %v1385_v47, %v1383_v16  ;;  %v3877_v49 = vld [vmem:[#allocation13 + $0x28] sm:$0xff]   ;;  %v3893_v16 = vld [vmem:[%s4259_s1] ss:$0 sm:$0xff] }
 0x266   : > { %v2857_v62 = vpop.eup %2856  ;;  %v1296_v63 = vadd.f32 1.0, %v2855_v58  ;;  %v1408_v3 = vpack.c.bf16 %v1386_v59, %v1384_v57 }
 0x267   : > { %v2859_v5 = vpop.eup %2858  ;;  %2876 = vrcp.f32 %v1295_v60  ;;  %v1297_v6 = vadd.f32 1.0, %v2857_v62 }
 0x268   : > { %v2861_v40 = vpop.eup %2860  ;;  %2878 = vrcp.f32 %v1296_v63  ;;  %v1298_v48 = vadd.f32 1.0, %v2859_v5  ;;  %1614 = vmatprep.mubr.bf16.mxu1 %v1408_v3 }
 0x269   : > { %v2863_v7 = vpop.eup %2862  ;;  %2880 = vrcp.f32 %v1297_v6  ;;  %v1387_v9 = vmul.f32 %v2861_v40, %v3799_v0 }
 0x26a   : > { %v2865_v23 = vpop.eup %2864  ;;  %2882 = vrcp.f32 %v1298_v48  ;;  %1615 = vmatmul.mubr.bf16.gmra.mrb[16].mxu1 %v1407_v61  ;;  %v1388_v35 = vmul.f32 %v2863_v7, %v3802_v17 }
 0x26b   : > { %v2867_v56 = vpop.eup %2866  ;;  %v1389_v11 = vmul.f32 %v2865_v23, %v3807_v25 }
 0x26c   : > { %v2869_v30 = vpop.eup %2868  ;;  %v1390_v13 = vmul.f32 %v2867_v56, %v3814_v33 }
 0x26d   : > { %v2871_v14 = vpop.eup %2870  ;;  %v1299_v21 = vadd.f32 1.0, %v2869_v30  ;;  %v1409_v32 = vpack.c.bf16 %v1389_v11, %v1387_v9 }
 0x26e   : > { %v2873_v38 = vpop.eup %2872  ;;  %v1300_v24 = vadd.f32 1.0, %v2871_v14  ;;  %v1410_v27 = vpack.c.bf16 %v1390_v13, %v1388_v35 }
 0x26f   : > { %v2875_v29 = vpop.eup %2874  ;;  %2884 = vrcp.f32 %v1299_v21  ;;  %v1301_v34 = vadd.f32 1.0, %v2873_v38 }
 0x270   : > { %2886 = vrcp.f32 %v1300_v24  ;;  %v1302_v4 = vadd.f32 1.0, %v2875_v29  ;;  %1622 = vmatprep.mubr.bf16.mxu1 %v1410_v27 }
 0x271   : > { %v2877_v0 = vpop.eup %2876  ;;  %2888 = vrcp.f32 %v1301_v34 }
 0x272   : > { %v2879_v25 = vpop.eup %2878  ;;  %2890 = vrcp.f32 %v1302_v4  ;;  %1623 = vmatmul.mubr.bf16.gmra.mrb[20].mxu1 %v1409_v32  ;;  %v1391_v33 = vmul.f32 %v2877_v0, %v3825_v26 }
 0x273   : > { %v2881_v17 = vpop.eup %2880  ;;  %v1392_v37 = vmul.f32 %v2879_v25, %v3828_v54 }
 0x274   : > { %v2883_v36 = vpop.eup %2882  ;;  %v1393_v12 = vmul.f32 %v2881_v17, %v3832_v51 }
 0x275   : > { %v1394_v39 = vmul.f32 %v2883_v36, %v3836_v1  ;;  %v2760_v1 = vld [vmem:[#allocation13 + $0x20] sm:$0xff]  }
 0x276   : > { %v1411_v41 = vpack.c.bf16 %v1393_v12, %v1391_v33  ;;  %2476 = vmatprep.subr.bf16.mxu1 %v2760_v1 }
 0x277   : > { %v1412_v42 = vpack.c.bf16 %v1394_v39, %v1392_v37  ;;  %2477 = vmatpush3.bf16.msra.mxu1 %v2760_v1 }
 0x278   : > { %2478 = vmatprep.subr.bf16.mxu1 %v3877_v49 }
 0x279   : > { %v2885_v43 = vpop.eup %2884  ;;  %1630 = vmatprep.mubr.bf16.mxu1 %v1412_v42 }
 0x27a   : > { %v2887_v44 = vpop.eup %2886  ;;  %1631 = vmatmul.mubr.bf16.gmra.mrb[24].mxu1 %v1411_v41  ;;  %v1395_v8 = vmul.f32 %v2885_v43, %v3845_v22  ;;  %v3881_v22 = vld [vmem:[#allocation13 + $0x30] sm:$0xff]  }
 0x27b   : > { %v2889_v45 = vpop.eup %2888  ;;  %v1396_v26 = vmul.f32 %v2887_v44, %v3848_v31  ;;  %2479 = vmatpush3.bf16.msra.mxu1 %v3877_v49  ;;  %v3885_v31 = vld [vmem:[#allocation13 + $0x38] sm:$0xff]  }
 0x27c   : > { %v2891_v46 = vpop.eup %2890  ;;  %v1397_v20 = vmul.f32 %v2889_v45, %v3852_v19  ;;  %2480 = vmatprep.subr.bf16.mxu1 %v3881_v22 }
 0x27d   : > { %v1398_v51 = vmul.f32 %v2891_v46, %v3856_v18 }
 0x27e   : > { %v1413_v15 = vpack.c.bf16 %v1397_v20, %v1395_v8 }
 0x27f   : > { %v1414_v54 = vpack.c.bf16 %v1398_v51, %v1396_v26  ;;  %2481 = vmatpush3.bf16.msra.mxu1 %v3881_v22 }
 0x280   : > { %2482 = vmatprep.subr.bf16.mxu1 %v3885_v31 }
 0x281   : > { %1638 = vmatprep.mubr.bf16.mxu1 %v1414_v54 }
 0x282   : > { %1639 = vmatmul.mubr.bf16.gmra.mrb[28].mxu1 %v1413_v15 }
 0x283   : > { %2483 = vmatpush3.bf16.msra.mxu1 %v3885_v31 }
 0x284   : > { %2500 = vmatprep.subr.bf16.mxu1 %v3694_v10 }
 0x31a   : > { %v2388_v19 = vpop.f32.mrb[0].mxu1 }
 0x31b   : > { %v2389_v18 = vpop.f32.mrb[1].mxu1 }
 0x31c   : > { %v2390_v52 = vadd.f32 %v2389_v18, %v2388_v19  ;;  %v2391_v53 = vpop.f32.mrb[2].mxu1 }
 0x31d   : > { %v2392_v47 = vpop.f32.mrb[3].mxu1 }
 0x31e   : > { %v2393_v55 = vadd.f32 %v2392_v47, %v2391_v53  ;;  %v3896_v57 = vadd.f32 %v2390_v52, %v3893_v16 }
 0x320   : > { %v3899_v59 = vadd.f32 %v2393_v55, %v3893_v16 }
 0x322   : > { %v2394_v58 = vpop.f32.mrb[4].mxu1  ;;  %v1647_v60 = vpack.c.bf16 %v3899_v59, %v3896_v57 }
 0x323   : > { %v2395_v61 = vpop.f32.mrb[5].mxu1 }
 0x324   : > { %v2396_v62 = vadd.f32 %v2395_v61, %v2394_v58  ;;  %v2397_v63 = vpop.f32.mrb[6].mxu1  ;;  %2484 = vmatprep.mubr.bf16.mxu1 %v1647_v60 }
 0x325   : > { %v2398_v3 = vpop.f32.mrb[7].mxu1 }
 0x326   : > { %v2399_v5 = vadd.f32 %v2398_v3, %v2397_v63  ;;  %v3904_v6 = vadd.f32 %v2396_v62, %v3893_v16 }
 0x328   : > { %v3907_v40 = vadd.f32 %v2399_v5, %v3893_v16 }
 0x32a   : > { %v1648_v48 = vpack.c.bf16 %v3907_v40, %v3904_v6 }
 0x32b   : > { %v2400_v7 = vpop.f32.mrb[8].mxu1 }
 0x32c   : > { %v2401_v23 = vpop.f32.mrb[9].mxu1  ;;  %2485 = vmatmul.mubr.bf16.vlgmr.msra.gmra.mrb[32].mxu1 %v1648_v48 }
 0x32d   : > { %v2402_v56 = vadd.f32 %v2401_v23, %v2400_v7  ;;  %v2403_v9 = vpop.f32.mrb[10].mxu1  ;;  %2501 = vmatpush3.bf16.msra.mxu1 %v3694_v10 }
 0x32e   : > { %v2404_v11 = vpop.f32.mrb[11].mxu1  ;;  %2502 = vmatprep.subr.bf16.mxu1 %v3782_v50 }
 0x32f   : > { %v2405_v30 = vadd.f32 %v2404_v11, %v2403_v9  ;;  %v3914_v35 = vadd.f32 %v2402_v56, %v3893_v16 }
 0x331   : > { %v3917_v13 = vadd.f32 %v2405_v30, %v3893_v16  ;;  %2503 = vmatpush3.bf16.msra.mxu1 %v3782_v50 }
 0x332   : > { %2504 = vmatprep.subr.bf16.mxu1 %v3794_v2 }
 0x333   : > { %v1649_v14 = vpack.c.bf16 %v3917_v13, %v3914_v35 }
 0x335   : > { %v2406_v21 = vpop.f32.mrb[12].mxu1  ;;  %2488 = vmatprep.mubr.bf16.mxu1 %v1649_v14  ;;  %2505 = vmatpush3.bf16.msra.mxu1 %v3794_v2 }
 0x336   : > { %v2407_v10 = vpop.f32.mrb[13].mxu1  ;;  %2506 = vmatprep.subr.bf16.mxu1 %v3810_v28 }
 0x337   : > { %v2408_v32 = vadd.f32 %v2407_v10, %v2406_v21  ;;  %v2409_v38 = vpop.f32.mrb[14].mxu1 }
 0x338   : > { %v2410_v24 = vpop.f32.mrb[15].mxu1 }
 0x339   : > { %v2411_v27 = vadd.f32 %v2410_v24, %v2409_v38  ;;  %2507 = vmatpush3.bf16.msra.mxu1 %v3810_v28  ;;  %v3927_v50 = vadd.f32 %v2408_v32, %v3893_v16 }
 0x33a   : > { %2508 = vmatprep.subr.bf16.mxu1 %v2760_v1 }
 0x33b   : > { %v3930_v29 = vadd.f32 %v2411_v27, %v3893_v16 }
 0x33d   : > { %v2412_v34 = vpop.f32.mrb[16].mxu1  ;;  %v1650_v2 = vpack.c.bf16 %v3930_v29, %v3927_v50  ;;  %2509 = vmatpush3.bf16.msra.mxu1 %v2760_v1 }
 0x33e   : > { %v2413_v4 = vpop.f32.mrb[17].mxu1  ;;  %2510 = vmatprep.subr.bf16.mxu1 %v3877_v49 }
 0x33f   : > { %v2414_v0 = vadd.f32 %v2413_v4, %v2412_v34  ;;  %v2415_v25 = vpop.f32.mrb[18].mxu1  ;;  %2489 = vmatmul.mubr.bf16.gmra.mrb[36].mxu1 %v1650_v2 }
 0x340   : > { %v2416_v17 = vpop.f32.mrb[19].mxu1 }
 0x341   : > { %v2417_v28 = vadd.f32 %v2416_v17, %v2415_v25  ;;  %2511 = vmatpush3.bf16.msra.mxu1 %v3877_v49  ;;  %v3938_v36 = vadd.f32 %v2414_v0, %v3893_v16 }
 0x342   : > { %2512 = vmatprep.subr.bf16.mxu1 %v3881_v22 }
 0x343   : > { %v3941_v33 = vadd.f32 %v2417_v28, %v3893_v16 }
 0x345   : > { %v2418_v12 = vpop.f32.mrb[20].mxu1  ;;  %v1651_v37 = vpack.c.bf16 %v3941_v33, %v3938_v36  ;;  %2513 = vmatpush3.bf16.msra.mxu1 %v3881_v22 }
 0x346   : > { %v2419_v39 = vpop.f32.mrb[21].mxu1  ;;  %2514 = vmatprep.subr.bf16.mxu1 %v3885_v31 }
 0x347   : > { %v2420_v41 = vadd.f32 %v2419_v39, %v2418_v12  ;;  %v2421_v42 = vpop.f32.mrb[22].mxu1  ;;  %2492 = vmatprep.mubr.bf16.mxu1 %v1651_v37 }
 0x348   : > { %v2422_v43 = vpop.f32.mrb[23].mxu1 }
 0x349   : > { %v2423_v44 = vadd.f32 %v2422_v43, %v2421_v42  ;;  %2515 = vmatpush3.bf16.msra.mxu1 %v3885_v31  ;;  %v1625_v45 = vadd.f32 %v2420_v41, %v3893_v16 }
 0x34b   : > { %v1628_v46 = vadd.f32 %v2423_v44, %v3893_v16 }
 0x34d   : > { %v2424_v8 = vpop.f32.mrb[24].mxu1  ;;  %v1652_v20 = vpack.c.bf16 %v1628_v46, %v1625_v45 }
 0x34e   : > { %v2425_v26 = vpop.f32.mrb[25].mxu1 }
 0x34f   : > { %v2426_v51 = vadd.f32 %v2425_v26, %v2424_v8  ;;  %v2427_v15 = vpop.f32.mrb[26].mxu1  ;;  %2493 = vmatmul.mubr.bf16.gmra.mrb[40].mxu1 %v1652_v20 }
 0x350   : > { %v2428_v54 = vpop.f32.mrb[27].mxu1 }
 0x351   : > { %v2429_v1 = vadd.f32 %v2428_v54, %v2427_v15  ;;  %v3951_v49 = vadd.f32 %v2426_v51, %v3893_v16 }
 0x353   : > { %v3954_v22 = vadd.f32 %v2429_v1, %v3893_v16 }
 0x355   : > { %v2430_v19 = vpop.f32.mrb[28].mxu1  ;;  %v1653_v31 = vpack.c.bf16 %v3954_v22, %v3951_v49 }
 0x356   : > { %v2431_v18 = vpop.f32.mrb[29].mxu1 }
 0x357   : > { %v2432_v52 = vadd.f32 %v2431_v18, %v2430_v19  ;;  %v2433_v53 = vpop.f32.mrb[30].mxu1  ;;  %2496 = vmatprep.mubr.bf16.mxu1 %v1653_v31 }
 0x358   : > { %v2434_v47 = vpop.f32.mrb[31].mxu1 }
 0x359   : > { %v2435_v55 = vadd.f32 %v2434_v47, %v2433_v53  ;;  %v1641_v58 = vadd.f32 %v2432_v52, %v3893_v16 }
 0x35b   : > { %v1644_v60 = vadd.f32 %v2435_v55, %v3893_v16 }
 0x35d   : > { %v1654_v61 = vpack.c.bf16 %v1644_v60, %v1641_v58 }
 0x35f   : > { %2497 = vmatmul.mubr.bf16.gmra.mrb[44].mxu1 %v1654_v61 }
 0x3ff   : > { %v2486_v62 = vpop.f32.mrb[32].mxu1 }
 0x400   : > { %v1753_v63 = vpop.f32.mrb[33].mxu1  ;;  %v3964_v48 = vsub.f32 %v3904_v6, %v2486_v62  ;;  %v4039_v62 = vld [vmem:[%s4260_s26] ss:$0 sm:$0xff] }
 0x401   : > { %v3961_v3 = vsub.f32 %v3896_v57, %v1753_v63  ;;  %v2487_v5 = vpop.f32.mrb[34].mxu1 }
 0x402   : > { %v3967_v7 = vsub.f32 %v3907_v40, %v2487_v5  ;;  %v1756_v23 = vpop.f32.mrb[35].mxu1  ;;  %v1834_v6 = vmul.f32 %v3964_v48, %v3964_v48 }
 0x403   : > { %v3970_v56 = vsub.f32 %v3899_v59, %v1756_v23  ;;  %v1832_v9 = vmul.f32 %v3961_v3, %v3961_v3 }
 0x404   : > { %v1835_v16 = vmul.f32 %v3967_v7, %v3967_v7 }
 0x405   : > { %v1833_v57 = vmul.f32 %v3970_v56, %v3970_v56 }
 0x406   : > { %v1849_v30 = vpack.c.bf16 %v1835_v16, %v1834_v6 }
 0x407   : > { %v1848_v11 = vpack.c.bf16 %v1833_v57, %v1832_v9  ;;  %v4045_v9 = vld [vmem:[%s4261_s11] ss:$0 sm:$0xff] }
 0x409   : > { %2516 = vmatprep.mubr.bf16.mxu1 %v1848_v11 }
 0x40a   : > { %2517 = vmatmul.mubr.bf16.vlgmr.msra.gmra.mrb[48].mxu1 %v1849_v30 }
 0x412   : > { %v2490_v40 = vpop.f32.mrb[36].mxu1 }
 0x413   : > { %v1769_v14 = vpop.f32.mrb[37].mxu1  ;;  %v3984_v10 = vsub.f32 %v3927_v50, %v2490_v40 }
 0x414   : > { %v3981_v59 = vsub.f32 %v3914_v35, %v1769_v14  ;;  %v2491_v21 = vpop.f32.mrb[38].mxu1 }
 0x415   : > { %v3987_v32 = vsub.f32 %v3930_v29, %v2491_v21  ;;  %v1772_v38 = vpop.f32.mrb[39].mxu1  ;;  %v1838_v50 = vmul.f32 %v3984_v10, %v3984_v10 }
 0x416   : > { %v3990_v24 = vsub.f32 %v3917_v13, %v1772_v38  ;;  %v1836_v34 = vmul.f32 %v3981_v59, %v3981_v59 }
 0x417   : > { %v1839_v27 = vmul.f32 %v3987_v32, %v3987_v32 }
 0x418   : > { %v1837_v35 = vmul.f32 %v3990_v24, %v3990_v24 }
 0x419   : > { %v1851_v4 = vpack.c.bf16 %v1839_v27, %v1838_v50  ;;  %v2924_v50 = vld [vmem:[%s3628_s29 + $0x10] sm:$0xff] }
 0x41a   : > { %v1850_v2 = vpack.c.bf16 %v1837_v35, %v1836_v34 }
 0x41c   : > { %2520 = vmatprep.mubr.bf16.mxu1 %v1850_v2 }
 0x41d   : > { %2521 = vmatmul.mubr.bf16.gmra.mrb[52].mxu1 %v1851_v4 }
 0x422   : > { %v2494_v29 = vpop.f32.mrb[40].mxu1 }
 0x423   : > { %v1785_v0 = vpop.f32.mrb[41].mxu1  ;;  %v4003_v17 = vsub.f32 %v1625_v45, %v2494_v29  ;;  %v2925_v29 = vld [vmem:[%s3628_s29] sm:$0xff] }
 0x424   : > { %v4001_v13 = vsub.f32 %v3938_v36, %v1785_v0  ;;  %v2495_v25 = vpop.f32.mrb[42].mxu1 }
 0x425   : > { %v4005_v28 = vsub.f32 %v1628_v46, %v2495_v25  ;;  %v1788_v12 = vpop.f32.mrb[43].mxu1  ;;  %v1842_v36 = vmul.f32 %v4003_v17, %v4003_v17 }
 0x426   : > { %v4008_v37 = vsub.f32 %v3941_v33, %v1788_v12  ;;  %v1840_v41 = vmul.f32 %v4001_v13, %v4001_v13 }
 0x427   : > { %v1843_v39 = vmul.f32 %v4005_v28, %v4005_v28 }
 0x428   : > { %v1841_v42 = vmul.f32 %v4008_v37, %v4008_v37 }
 0x429   : > { %v1853_v44 = vpack.c.bf16 %v1843_v39, %v1842_v36  ;;  %v2927_v36 = vld [vmem:[%s3628_s29 + $0x8] sm:$0xff] }
 0x42a   : > { %v1852_v43 = vpack.c.bf16 %v1841_v42, %v1840_v41 }
 0x42c   : > { %2524 = vmatprep.mubr.bf16.mxu1 %v1852_v43 }
 0x42d   : > { %2525 = vmatmul.mubr.bf16.gmra.mrb[56].mxu1 %v1853_v44 }
 0x432   : > { %v2498_v45 = vpop.f32.mrb[44].mxu1 }
 0x433   : > { %v1801_v46 = vpop.f32.mrb[45].mxu1  ;;  %v4021_v20 = vsub.f32 %v1641_v58, %v2498_v45 }
 0x434   : > { %v4019_v33 = vsub.f32 %v3951_v49, %v1801_v46  ;;  %v2499_v8 = vpop.f32.mrb[46].mxu1 }
 0x435   : > { %v4023_v26 = vsub.f32 %v1644_v60, %v2499_v8  ;;  %v1804_v51 = vpop.f32.mrb[47].mxu1  ;;  %v1846_v49 = vmul.f32 %v4021_v20, %v4021_v20 }
 0x436   : > { %v4026_v15 = vsub.f32 %v3954_v22, %v1804_v51  ;;  %v1844_v1 = vmul.f32 %v4019_v33, %v4019_v33 }
 0x437   : > { %v1847_v54 = vmul.f32 %v4023_v26, %v4023_v26 }
 0x438   : > { %v1845_v19 = vmul.f32 %v4026_v15, %v4026_v15 }
 0x439   : > { %v1855_v18 = vpack.c.bf16 %v1847_v54, %v1846_v49 }
 0x43a   : > { %v1854_v31 = vpack.c.bf16 %v1845_v19, %v1844_v1 }
 0x43c   : > { %2528 = vmatprep.mubr.bf16.mxu1 %v1854_v31 }
 0x43d   : > { %2529 = vmatmul.mubr.bf16.gmra.mrb[60].mxu1 %v1855_v18 }
 0x4dd   : > { %v2518_v52 = vpop.f32.mrb[48].mxu1 }
 0x4de   : > { %v1900_v53 = vadd.f32 1e-05, %v2518_v52  ;;  %v1891_v22 = vpop.f32.mrb[49].mxu1 }
 0x4df   : > { %v1892_v47 = vadd.f32 1e-05, %v1891_v22  ;;  %v2519_v55 = vpop.f32.mrb[50].mxu1 }
 0x4e0   : > { %2892 = vrsqrt.f32 %v1900_v53  ;;  %v1903_v58 = vadd.f32 1e-05, %v2519_v55  ;;  %v1894_v60 = vpop.f32.mrb[51].mxu1 }
 0x4e1   : > { %2894 = vrsqrt.f32 %v1892_v47  ;;  %v1895_v61 = vadd.f32 1e-05, %v1894_v60 }
 0x4e2   : > { %2896 = vrsqrt.f32 %v1903_v58 }
 0x4e3   : > { %2898 = vrsqrt.f32 %v1895_v61 }
 0x4ea   : > { %v2893_v63 = vpop.eup %2892 }
 0x4eb   : > { %v2895_v5 = vpop.eup %2894  ;;  %v1978_v23 = vmul.f32 %v2893_v63, %v4039_v62 }
 0x4ec   : > { %v2897_v16 = vpop.eup %2896  ;;  %v1976_v57 = vmul.f32 %v2895_v5, %v4039_v62  ;;  %v2928_v5 = vld [vmem:[%s3628_s29 + $0x30] sm:$0xff] }
 0x4ed   : > { %v2899_v6 = vpop.eup %2898  ;;  %v1994_v11 = vmul.f32 %v1978_v23, %v3964_v48  ;;  %v1979_v30 = vmul.f32 %v2897_v16, %v4039_v62 }
 0x4ee   : > { %v1992_v40 = vmul.f32 %v1976_v57, %v3961_v3  ;;  %v1977_v14 = vmul.f32 %v2899_v6, %v4039_v62  ;;  %v2929_v57 = vld [vmem:[%s3628_s29 + $0x20] sm:$0xff] }
 0x4ef   : > { %v2017_v21 = vadd.f32 %v4045_v9, %v1994_v11  ;;  %v1995_v38 = vmul.f32 %v1979_v30, %v3967_v7  ;;  %v2926_v7 = vld [vmem:[%s3628_s29 + $0x18] sm:$0xff] }
 0x4f0   : > { %v2015_v27 = vadd.f32 %v4045_v9, %v1992_v40  ;;  %v1993_v34 = vmul.f32 %v1977_v14, %v3970_v56  ;;  %v2522_v35 = vpop.f32.mrb[52].mxu1  ;;  %v2931_v40 = vld [vmem:[%s3628_s29 + $0x28] sm:$0xff] }
 0x4f1   : > { %v2033_v2 = vadd.f32 %v2924_v50, %v2017_v21  ;;  %v2018_v48 = vadd.f32 %v4045_v9, %v1995_v38  ;;  %v1916_v4 = vadd.f32 1e-05, %v2522_v35  ;;  %v1907_v3 = vpop.f32.mrb[53].mxu1 }
 0x4f2   : > { %v2031_v0 = vadd.f32 %v2925_v29, %v2015_v27  ;;  %v2016_v25 = vadd.f32 %v4045_v9, %v1993_v34  ;;  %v1908_v12 = vadd.f32 1e-05, %v1907_v3  ;;  %v2523_v39 = vpop.f32.mrb[54].mxu1 }
 0x4f3   : > { %2049 = vst [vmem:[%s4061_s30 + $0x10] sm:$0xff] %v2033_v2  ;;  %v2034_v56 = vadd.f32 %v2926_v7, %v2018_v48  ;;  %2900 = vrsqrt.f32 %v1916_v4  ;;  %v1919_v41 = vadd.f32 1e-05, %v2523_v39  ;;  %v1910_v42 = vpop.f32.mrb[55].mxu1 }
 0x4f4   : > { %2047 = vst [vmem:[%s4061_s30] sm:$0xff] %v2031_v0  ;;  %v2032_v43 = vadd.f32 %v2927_v36, %v2016_v25  ;;  %2902 = vrsqrt.f32 %v1908_v12  ;;  %v1911_v44 = vadd.f32 1e-05, %v1910_v42  ;;  %v2932_v36 = vld [vmem:[%s3628_s29 + $0x50] sm:$0xff] }
 0x4f5   : > { %2050 = vst [vmem:[%s4061_s30 + $0x18] sm:$0xff] %v2034_v56  ;;  %2904 = vrsqrt.f32 %v1919_v41 }
 0x4f6   : > { %2048 = vst [vmem:[%s4061_s30 + $0x8] sm:$0xff] %v2032_v43  ;;  %2906 = vrsqrt.f32 %v1911_v44 }
 0x4fd   : > { %v2901_v45 = vpop.eup %2900 }
 0x4fe   : > { %v2903_v46 = vpop.eup %2902  ;;  %v1982_v8 = vmul.f32 %v2901_v45, %v4039_v62  ;;  %v2933_v45 = vld [vmem:[%s3628_s29 + $0x40] sm:$0xff] }
 0x4ff   : > { %v2905_v51 = vpop.eup %2904  ;;  %v1980_v54 = vmul.f32 %v2903_v46, %v4039_v62 }
 0x500   : > { %v2907_v1 = vpop.eup %2906  ;;  %v1998_v19 = vmul.f32 %v1982_v8, %v3984_v10  ;;  %v1983_v49 = vmul.f32 %v2905_v51, %v4039_v62  ;;  %v2526_v31 = vpop.f32.mrb[56].mxu1 }
 0x501   : > { %v1996_v18 = vmul.f32 %v1980_v54, %v3981_v59  ;;  %v1981_v52 = vmul.f32 %v2907_v1, %v4039_v62  ;;  %v1932_v53 = vadd.f32 1e-05, %v2526_v31  ;;  %v1923_v22 = vpop.f32.mrb[57].mxu1  ;;  %v2935_v54 = vld [vmem:[%s3628_s29 + $0x48] sm:$0xff] }
 0x502   : > { %v2021_v47 = vadd.f32 %v4045_v9, %v1998_v19  ;;  %v1999_v55 = vmul.f32 %v1983_v49, %v3987_v32  ;;  %v1924_v58 = vadd.f32 1e-05, %v1923_v22  ;;  %v2527_v60 = vpop.f32.mrb[58].mxu1 }
 0x503   : > { %v2019_v10 = vadd.f32 %v4045_v9, %v1996_v18  ;;  %v1997_v61 = vmul.f32 %v1981_v52, %v3990_v24  ;;  %2908 = vrsqrt.f32 %v1932_v53  ;;  %v1935_v59 = vadd.f32 1e-05, %v2527_v60  ;;  %v1926_v63 = vpop.f32.mrb[59].mxu1  ;;  %v2930_v24 = vld [vmem:[%s3628_s29 + $0x38] sm:$0xff] }
 0x504   : > { %v2037_v23 = vadd.f32 %v2928_v5, %v2021_v47  ;;  %v2022_v16 = vadd.f32 %v4045_v9, %v1999_v55  ;;  %2910 = vrsqrt.f32 %v1924_v58  ;;  %v1927_v32 = vadd.f32 1e-05, %v1926_v63 }
 0x505   : > { %v2035_v6 = vadd.f32 %v2929_v57, %v2019_v10  ;;  %v2020_v11 = vadd.f32 %v4045_v9, %v1997_v61  ;;  %2912 = vrsqrt.f32 %v1935_v59 }
 0x506   : > { %2053 = vst [vmem:[%s4061_s30 + $0x30] sm:$0xff] %v2037_v23  ;;  %v2038_v30 = vadd.f32 %v2930_v24, %v2022_v16  ;;  %2914 = vrsqrt.f32 %v1927_v32  ;;  %v2938_v23 = vld [vmem:[%s3628_s29 + $0x78] sm:$0xff] }
 0x507   : > { %2051 = vst [vmem:[%s4061_s30 + $0x20] sm:$0xff] %v2035_v6  ;;  %v2036_v14 = vadd.f32 %v2931_v40, %v2020_v11 }
 0x508   : > { %2054 = vst [vmem:[%s4061_s30 + $0x38] sm:$0xff] %v2038_v30 }
 0x509   : > { %2052 = vst [vmem:[%s4061_s30 + $0x28] sm:$0xff] %v2036_v14 }
 0x50d   : > { %v2909_v21 = vpop.eup %2908 }
 0x50e   : > { %v2911_v38 = vpop.eup %2910  ;;  %v1986_v27 = vmul.f32 %v2909_v21, %v4039_v62 }
 0x50f   : > { %v2913_v34 = vpop.eup %2912  ;;  %v1984_v35 = vmul.f32 %v2911_v38, %v4039_v62 }
 0x510   : > { %v2915_v50 = vpop.eup %2914  ;;  %v2002_v2 = vmul.f32 %v1986_v27, %v4003_v17  ;;  %v1987_v48 = vmul.f32 %v2913_v34, %v4039_v62  ;;  %v2530_v4 = vpop.f32.mrb[60].mxu1 }
 0x511   : > { %v2000_v3 = vmul.f32 %v1984_v35, %v4001_v13  ;;  %v1985_v29 = vmul.f32 %v2915_v50, %v4039_v62  ;;  %v1948_v0 = vadd.f32 1e-05, %v2530_v4  ;;  %v1939_v25 = vpop.f32.mrb[61].mxu1 }
 0x512   : > { %v2025_v12 = vadd.f32 %v4045_v9, %v2002_v2  ;;  %v2003_v39 = vmul.f32 %v1987_v48, %v4005_v28  ;;  %v1940_v7 = vadd.f32 1e-05, %v1939_v25  ;;  %v2531_v56 = vpop.f32.mrb[62].mxu1 }
 0x513   : > { %v2023_v17 = vadd.f32 %v4045_v9, %v2000_v3  ;;  %v2001_v41 = vmul.f32 %v1985_v29, %v4008_v37  ;;  %2916 = vrsqrt.f32 %v1948_v0  ;;  %v1951_v13 = vadd.f32 1e-05, %v2531_v56  ;;  %v1942_v42 = vpop.f32.mrb[63].mxu1  ;;  %v2934_v37 = vld [vmem:[%s3628_s29 + $0x58] sm:$0xff] }
 0x514   : > { %v2041_v43 = vadd.f32 %v2932_v36, %v2025_v12  ;;  %v2026_v44 = vadd.f32 %v4045_v9, %v2003_v39  ;;  %2918 = vrsqrt.f32 %v1940_v7  ;;  %v1943_v28 = vadd.f32 1e-05, %v1942_v42 }
 0x515   : > { %v2039_v46 = vadd.f32 %v2933_v45, %v2023_v17  ;;  %v2024_v8 = vadd.f32 %v4045_v9, %v2001_v41  ;;  %2920 = vrsqrt.f32 %v1951_v13 }
 0x516   : > { %2057 = vst [vmem:[%s4061_s30 + $0x50] sm:$0xff] %v2041_v43  ;;  %v2042_v51 = vadd.f32 %v2934_v37, %v2026_v44  ;;  %2922 = vrsqrt.f32 %v1943_v28 }
 0x517   : > { %2055 = vst [vmem:[%s4061_s30 + $0x40] sm:$0xff] %v2039_v46  ;;  %v2040_v1 = vadd.f32 %v2935_v54, %v2024_v8 }
 0x518   : > { %2058 = vst [vmem:[%s4061_s30 + $0x58] sm:$0xff] %v2042_v51 }
 0x519   : > { %2056 = vst [vmem:[%s4061_s30 + $0x48] sm:$0xff] %v2040_v1 }
 0x51d   : > { %v2917_v19 = vpop.eup %2916 }
 0x51e   : > { %v2919_v49 = vpop.eup %2918  ;;  %v1990_v31 = vmul.f32 %v2917_v19, %v4039_v62 }
 0x51f   : > { %v2921_v18 = vpop.eup %2920  ;;  %v1988_v52 = vmul.f32 %v2919_v49, %v4039_v62 }
 0x520   : > { %v2923_v53 = vpop.eup %2922  ;;  %v2006_v22 = vmul.f32 %v1990_v31, %v4021_v20  ;;  %v1991_v47 = vmul.f32 %v2921_v18, %v4039_v62  ;;  %v2936_v20 = vld [vmem:[%s3628_s29 + $0x70] sm:$0xff] }
 0x521   : > { %v2004_v55 = vmul.f32 %v1988_v52, %v4019_v33  ;;  %v1989_v58 = vmul.f32 %v2923_v53, %v4039_v62  ;;  %v2937_v62 = vld [vmem:[%s3628_s29 + $0x60] sm:$0xff] }
 0x522   : > { %v2029_v60 = vadd.f32 %v4045_v9, %v2006_v22  ;;  %v2007_v10 = vmul.f32 %v1991_v47, %v4023_v26 }
 0x523   : > { %v2027_v61 = vadd.f32 %v4045_v9, %v2004_v55  ;;  %v2005_v59 = vmul.f32 %v1989_v58, %v4026_v15  ;;  %v2939_v15 = vld [vmem:[%s3628_s29 + $0x68] sm:$0xff] }
 0x524   : > { %v2045_v63 = vadd.f32 %v2936_v20, %v2029_v60  ;;  %v2030_v33 = vadd.f32 %v4045_v9, %v2007_v10 }
 0x525   : > { %v2043_v5 = vadd.f32 %v2937_v62, %v2027_v61  ;;  %v2028_v26 = vadd.f32 %v4045_v9, %v2005_v59 }
 0x526   : > { %2061 = vst [vmem:[%s4061_s30 + $0x70] sm:$0xff] %v2045_v63  ;;  %v2046_v16 = vadd.f32 %v2938_v23, %v2030_v33 }
 0x527   : > { %2059 = vst [vmem:[%s4061_s30 + $0x60] sm:$0xff] %v2043_v5  ;;  %v2044_v32 = vadd.f32 %v2939_v15, %v2028_v26 }
 0x528   : > { %2062 = vst [vmem:[%s4061_s30 + $0x78] sm:$0xff] %v2046_v16 }
 0x529   : > { %2060 = vst [vmem:[%s4061_s30 + $0x68] sm:$0xff] %v2044_v32 }
 0x52a   : > { %3155 = shalt.err (!%p3152_p12)
}
 0x52b   : > { %s3156_s29 = scalar_lea.hbm %s4130_s21, 2048  ;;  %s3160_s1 = scalar_lea.hbm %s4263_s27, 4096 }
 0x52c   : > { %p3157_p8 = scmp.ne.s32.totalorder %s4130_s21, %s3156_s29  ;;  %p3161_p1 = scmp.lt.u32.totalorder %s4130_s21, %s4263_s27 }
 0x52d   : > { %p3162_p6 = scmp.lt.u32.totalorder %s3160_s1, %s3156_s29  ;;  %p3164_p5 = scmp.lt.u32.totalorder %s3156_s29, %s4130_s21 }
 0x52e   : > { %p3158_p10 = pnand %p3157_p8, %p4264_p2 }
 0x52f   : > { %p3163_p3 = por %p3162_p6, %p3161_p1 }
 0x530   : > { %p3159_p0 = pneg %p3158_p10 }
 0x531   : > { %p3165_p4 = por %p3164_p5, %p3163_p3 }
 0x533   : > { %p3166_p11 = pnand %p3165_p4, %p3159_p0 }
 0x535   : > { %3169 = shalt.err (!%p3166_p11)
}
 0x536   : > { %s3235_s26 = smov 128   ;;  %s3236_s9 = smov 8  }
 0x537   : > { %2586 = dma.vmem_to_hbm [thread:$0]  (%p4264_p2), %s4132_s22, 2048, %s4130_s21, %s2064_s6, %s3235_s26, %s3235_s26, %s3236_s9  }
 0x538 PF: > { %s4265_s16 = sld [smem:[#allocation20_spill]]  ;;  %s4266_s11 = sld [smem:[#allocation22_spill]] }
 0x539   : > { %s4267_s30 = sld [smem:[#allocation21_spill]] }
 0x53e   : > { %s2092_s10 = sand.u32 1, %s4265_s16   ;;  %p4268_p13 = scmp.ne.s32.totalorder %s4266_s11, 0 }
 0x53f   : > { %p4269_p9 = scmp.ge.s32.totalorder %s4267_s30, 2  ;;  %s2093_s28 = scalar_lea.sflag [#allocation4], %s2092_s10 }
 0x541   : > { %p2612_p7 = pnand %p4269_p9, %p4268_p13 }
 0x543   : > { %3203 = dma.done.wait (!%p2612_p7), %s2093_s28, 2048  }
 0x544   : > { %3205 = vsyncadd (!%p2612_p7), %s2093_s28, 4294965248  ;;  %s4270_s20 = sld [smem:[#allocation23_spill]]  ;;  %s4271_s24 = sld [smem:[#allocation24_spill]] }
 0x545   : > { %s4272_s17 = smov %s3212_s18  ;;  %s4273_s18 = smov %s3216_s19 }
 0x54a   : > { %p29_p12 = scmp.ge.s32.totalorder %s4270_s20, 4   ;;  %s4274_s19 = smov %s4271_s24 }
 0x54c   :  { %31 = sbr.rel (!%p29_p12) target bundleno = 17 (0x11), region = 149 }
 0x553   :  { %2098 = vsyncpa [#allocation3], 1 }
 0x554   :  { %2100 = vsyncpa [#allocation3 + $0x1], 1 }
 0x555   :  { %2101 = vsyncpa [#allocation6], 1 }
 0x556   :  { %2103 = vsyncpa [#allocation6 + $0x1], 1 }
 0x557   :  { %2104 = vsyncpa [#allocation9], 1 }
 0x558   :  { %2105 = vsyncpa [#allocation12], 1 }
 0x559   :  { %2106 = vsyncpa [#allocation4], 1 }
 0x55a   :  { %2108 = vsyncpa [#allocation4 + $0x1], 1 }

</bundles_post_ra>
